<compile_context>
chip_gen: v7x
topology: tpu7x:2x2x1
jax: 0.10.0
libtpu: 0.0.40
codegen_flags: <defaults>
</compile_context>

<pallas_src>
import jax
import jax.numpy as jnp
import numpy as np
from jax import lax
from jax.experimental import pallas as pl
from jax.experimental.pallas import tpu as pltpu

_INT32_MIN = int(np.iinfo(np.int32).min)


def _round_up(x, m):
    return (x + m - 1) // m * m


def _pick_tile(n_pad, target):
    t = min(int(target), n_pad)
    while n_pad % t != 0:
        t //= 2
    return max(t, 128)


def _device_tuning():
    """Best-effort per-generation tile / VMEM-budget selection."""
    kind = ""
    vmem_cap = 128 * 1024 * 1024
    try:
        kind = jax.devices()[0].device_kind.lower()
    except Exception:
        pass
    try:
        vmem_cap = int(pltpu.get_tpu_info().vmem_capacity_bytes)
    except Exception:
        pass
    is_v5e = ("v5 lite" in kind) or ("v5e" in kind) or ("v5litepod" in kind)
    if vmem_cap <= 64 * 1024 * 1024:
        # v7x-class: half the VMEM of v5e/v6e, two TensorCores.
        return dict(tq=256, tk=512, vmem_limit=48 * 1024 * 1024, even_q=True)
    if is_v5e:
        # v5e: weaker MXU / HBM BW / single vector-store slot -> smaller tile.
        return dict(tq=256, tk=256, vmem_limit=64 * 1024 * 1024, even_q=False)
    return dict(tq=256, tk=512, vmem_limit=64 * 1024 * 1024, even_q=False)


def _supcon_tile_kernel(n_valid, tq, tk, has_pad, precision):
    """Stage 1: per-row streaming stats over column tiles."""

    def kernel(zq_ref, zt_ref, gr_ref, gc_ref,   # inputs
               num_ref, den_ref,                 # per-row outputs
               m_sc, l_sc, s_sc, c_sc):          # (tq,1) f32 VMEM scratch
        q = pl.program_id(0)
        k = pl.program_id(1)
        nk = pl.num_programs(1)
        q_start = q * tq
        k_start = k * tk

        @pl.when(k == 0)
        def _():
            m_sc[...] = jnp.full(m_sc.shape, -jnp.inf, dtype=jnp.float32)
            l_sc[...] = jnp.zeros(l_sc.shape, dtype=jnp.float32)
            s_sc[...] = jnp.zeros(s_sc.shape, dtype=jnp.float32)
            c_sc[...] = jnp.zeros(c_sc.shape, dtype=jnp.float32)

        # (tq, tk) similarity tile.  Temperature is already folded into the row
        # operand and the column operand arrives pre-transposed (d, tk), so this
        # is a plain MXU matmul with no in-kernel transpose.
        a = jnp.dot(zq_ref[...], zt_ref[...],
                    preferred_element_type=jnp.float32, precision=precision)

        # Positive-pair predicate from the tiny gid tiles: (tq,1) == (1,tk).
        eq = gr_ref[...] == gc_ref[...]

        def update(a_lm, posf):
            tile_max = jnp.max(a_lm, axis=1, keepdims=True)
            m_prev = m_sc[...]
            m_new = jnp.maximum(m_prev, tile_max)
            alpha = jnp.exp(m_prev - m_new)
            p = jnp.exp(a_lm - m_new)                      # masked -> exp(-inf)=0
            l_sc[...] = l_sc[...] * alpha + jnp.sum(p, axis=1, keepdims=True)
            m_sc[...] = m_new
            s_sc[...] = s_sc[...] + jnp.sum(posf * a, axis=1, keepdims=True)
            c_sc[...] = c_sc[...] + jnp.sum(posf, axis=1, keepdims=True)

        # Only tiles touching the diagonal (plus, when rows are padded, the last
        # column tile) need the logits mask; interior tiles skip the iota
        # compares / ands / selects entirely (VPU is the bottleneck at small d).
        diag_overlap = jnp.logical_and(q_start < k_start + tk,
                                       k_start < q_start + tq)
        if has_pad:
            needs_mask = jnp.logical_or(diag_overlap, k == nk - 1)
        else:
            needs_mask = diag_overlap

        @pl.when(needs_mask)
        def _():
            row_i = q_start + lax.broadcasted_iota(jnp.int32, (tq, 1), 0)
            col_j = k_start + lax.broadcasted_iota(jnp.int32, (1, tk), 1)
            lm = jnp.logical_and(row_i != col_j, col_j < n_valid)
            a_lm = jnp.where(lm, a, -jnp.inf)
            posf = jnp.logical_and(lm, eq).astype(jnp.float32)
            update(a_lm, posf)

        @pl.when(jnp.logical_not(needs_mask))
        def _():
            update(a, eq.astype(jnp.float32))

        @pl.when(k == nk - 1)
        def _():
            c = c_sc[...]
            lse = m_sc[...] + jnp.log(l_sc[...])           # logsumexp over j != i
            u = s_sc[...] - c * lse                        # sum_j mask * log_sim
            c_safe = jnp.maximum(c, 1.0)                   # pad rows have c == 0
            num = u / (c_safe * (c + 1.0))                 # u / (c*(c+1))
            den = 1.0 / (c + 1.0)
            if has_pad:
                row_valid = (q_start + lax.broadcasted_iota(
                    jnp.int32, (tq, 1), 0)) < n_valid
                num = jnp.where(row_valid, num, 0.0)
                den = jnp.where(row_valid, den, 0.0)
            num_ref[...] = num
            den_ref[...] = den

    return kernel


def supcon_loss(z1, z2, temperature=1.0, labels=None, mask=None,
                block_q=None, block_k=None, use_bf16_matmul=True):
    """Pallas implementation of SupConLoss_.forward (returns a scalar)."""
    b, d = z1.shape
    assert z2.shape == (b, d)

    if labels is not None and mask is not None:
        raise ValueError("Cannot define both `labels` and `mask`")
    if mask is not None:
        # TODO(synk): an arbitrary user-supplied float mask is not expressible
        # as per-row group ids; the explicit `mask=` path is not implemented.
        raise NotImplementedError("explicit `mask=` path not supported")

    v = 2
    n = v * b
    if labels is None:
        gid = jnp.tile(jnp.arange(b, dtype=jnp.int32), (v,))      # gid[i] = i % b
    else:
        labels = jnp.asarray(labels).reshape(-1).astype(jnp.int32)
        if labels.shape[0] != b:
            raise ValueError("Num of labels does not match num of features")
        gid = jnp.tile(labels, (v,))

    tune = _device_tuning()
    n_pad = max(_round_up(n, 128), 128)
    d_pad = max(_round_up(d, 128), 128)   # lane-dense row operand, aligned MXU K
    tq = _pick_tile(n_pad, block_q if block_q is not None else tune["tq"])
    tk = _pick_tile(n_pad, block_k if block_k is not None else tune["tk"])
    if tune.get("even_q", False):
        # v7x megacore: keep an even number of q tiles so both TCs stay busy.
        while tq > 128 and (n_pad // tq) % 2 == 1:
            tq //= 2

    cdt = jnp.bfloat16 if use_bf16_matmul else jnp.float32
    precision = None if use_bf16_matmul else lax.Precision.HIGHEST
    inv_temp = 1.0 / float(temperature)

    z = jnp.concatenate([z1, z2], axis=0).astype(jnp.float32)     # (N, D)
    zp = jnp.zeros((n_pad, d_pad), jnp.float32).at[:n, :d].set(z)
    # Temperature folded into the (narrower) row operand; column operand is
    # shipped pre-transposed so the kernel runs a plain (tq,d)@(d,tk) matmul.
    # bf16 cast happens here (wrapper side), halving HBM->VMEM DMA bytes;
    # accumulation and all elementwise math stay f32 inside the kernel.
    z_rows = (zp * inv_temp).astype(cdt)                          # (n_pad, d_pad)
    z_cols = zp.T.astype(cdt)                                     # (d_pad, n_pad)

    gp = jnp.full((n_pad,), _INT32_MIN, jnp.int32).at[:n].set(gid)
    gid_row = gp.reshape(n_pad, 1)
    gid_col = gp.reshape(1, n_pad)

    has_pad = n_pad > n
    kernel = _supcon_tile_kernel(n, tq, tk, has_pad, precision)

    num, den = pl.pallas_call(
        kernel,
        out_shape=(jax.ShapeDtypeStruct((n_pad, 1), jnp.float32),
                   jax.ShapeDtypeStruct((n_pad, 1), jnp.float32)),
        grid_spec=pltpu.PrefetchScalarGridSpec(
            num_scalar_prefetch=0,
            grid=(n_pad // tq, n_pad // tk),
            in_specs=[
                pl.BlockSpec((tq, d_pad), lambda q, k: (q, 0)),   # scaled rows
                pl.BlockSpec((d_pad, tk), lambda q, k: (0, k)),   # z^T col tile
                pl.BlockSpec((tq, 1), lambda q, k: (q, 0)),       # gid rows
                pl.BlockSpec((1, tk), lambda q, k: (0, k)),       # gid cols
            ],
            out_specs=[
                pl.BlockSpec((tq, 1), lambda q, k: (q, 0)),
                pl.BlockSpec((tq, 1), lambda q, k: (q, 0)),
            ],
            # TODO(synk): fold m/l/s/c into one (tq,8) scratch to recover the
            # lane-padding (~384 KiB) if tile sizes are pushed to the budget.
            scratch_shapes=[pltpu.VMEM((tq, 1), jnp.float32)] * 4,
        ),
        compiler_params=pltpu.CompilerParams(
            dimension_semantics=("parallel", "arbitrary"),
            vmem_limit_bytes=tune["vmem_limit"],
        ),
    )(z_rows, z_cols, gid_row, gid_col)

    # TODO(synk): keep z^T fully VMEM-resident (index_map (0,0)) and slice the
    # k-tile in-kernel when it fits; skipped here to avoid dynamic lane-dim
    # slicing — streamed (d,tk) column tiles are double-buffered instead.
    # Final cross-row reduction is a trivial XLA reduce (no second pallas_call).
    return -(jnp.sum(num) / jnp.sum(den))


def _supcon_ref(z1, z2, temperature=1.0, labels=None):
    """Pure-numpy reference mirroring the PyTorch forward."""
    b = z1.shape[0]
    if labels is None:
        base = np.eye(b, dtype=np.float32)
    else:
        labels = np.asarray(labels).reshape(-1, 1)
        base = (labels == labels.T).astype(np.float32)
    z = np.concatenate([z1, z2], axis=0).astype(np.float32)
    sim = z @ z.T / temperature
    sim = sim - sim.max(axis=1, keepdims=True)
    mask = np.tile(base, (2, 2))
    logits_mask = np.ones_like(mask)
    np.fill_diagonal(logits_mask, 0.0)
    mask = mask * logits_mask
    exp_sim = np.exp(sim) * logits_mask
    log_sim = sim - np.log(exp_sim.sum(1, keepdims=True))
    msk_sum = (mask > 0).sum(1).astype(np.float32)
    bw = 1.0 / (msk_sum * (msk_sum + 1)) / (1.0 / (msk_sum + 1)).sum()
    return float(-(((mask * log_sim).sum(1)) * bw).sum())


if __name__ == "__main__":
    key = jax.random.PRNGKey(0)
    k1, k2, k3, k4, k5 = jax.random.split(key, 5)

    # Small default (eye-mask) case, f32 MXU path: bit-close to the reference.
    b, d = 4, 32
    z1 = jax.random.normal(k1, (b, d), dtype=jnp.float32)
    z2 = jax.random.normal(k2, (b, d), dtype=jnp.float32)
    loss = jax.block_until_ready(
        supcon_loss(z1, z2, temperature=1.0, use_bf16_matmul=False))
    ref = _supcon_ref(np.asarray(z1), np.asarray(z2), temperature=1.0)
    assert np.allclose(np.asarray(loss), ref, rtol=2e-4, atol=2e-5), (
        float(loss), ref)

    # Same case on the default bf16-MXU (f32 accumulation) path -> looser tol.
    loss_bf16 = jax.block_until_ready(supcon_loss(z1, z2, temperature=1.0))
    assert np.allclose(np.asarray(loss_bf16), ref, rtol=5e-2, atol=5e-3), (
        float(loss_bf16), ref)

    # Labels path.
    labels = jax.random.randint(k3, (b,), 0, 3)
    loss_lbl = jax.block_until_ready(
        supcon_loss(z1, z2, temperature=0.5, labels=labels,
                    use_bf16_matmul=False))
    ref_lbl = _supcon_ref(np.asarray(z1), np.asarray(z2), temperature=0.5,
                          labels=np.asarray(labels))
    assert np.allclose(np.asarray(loss_lbl), ref_lbl, rtol=2e-4, atol=2e-5), (
        float(loss_lbl), ref_lbl)

    # Multi-tile case (2x2 grid) exercising interior (unmasked), diagonal and
    # padded-column tile paths of the gated kernel.
    b2, d2 = 80, 32
    z1b = jax.random.normal(k4, (b2, d2), dtype=jnp.float32)
    z2b = jax.random.normal(k5, (b2, d2), dtype=jnp.float32)
    loss_big = jax.block_until_ready(
        supcon_loss(z1b, z2b, temperature=1.0, block_q=128, block_k=128,
                    use_bf16_matmul=False))
    ref_big = _supcon_ref(np.asarray(z1b), np.asarray(z2b), temperature=1.0)
    assert np.allclose(np.asarray(loss_big), ref_big, rtol=2e-4, atol=2e-5), (
        float(loss_big), ref_big)

    print("KERNEL_OK")
</pallas_src>

<mosaic_0001>
module attributes {stable_mosaic.version = 11 : i64} {
  func.func @kernel(%arg0: i32, %arg1: i32, %arg2: memref<128x128xf32, #tpu.memory_space<vmem>>, %arg3: memref<128x128xf32, #tpu.memory_space<vmem>>, %arg4: memref<128x1xi32, #tpu.memory_space<vmem>>, %arg5: memref<1x128xi32, #tpu.memory_space<vmem>>, %arg6: memref<128x1xf32, #tpu.memory_space<vmem>>, %arg7: memref<128x1xf32, #tpu.memory_space<vmem>>, %arg8: memref<128x1xf32, #tpu.memory_space<vmem>>, %arg9: memref<128x1xf32, #tpu.memory_space<vmem>>, %arg10: memref<128x1xf32, #tpu.memory_space<vmem>>, %arg11: memref<128x1xf32, #tpu.memory_space<vmem>>) attributes {dimension_semantics = [#tpu.dimension_semantics<parallel>, #tpu.dimension_semantics<arbitrary>], iteration_bounds = array<i64: 1, 1>, scalar_prefetch = 0 : i64, scratch_operands = 4 : i64, tpu.core_type = #tpu.core_type<tc>, window_params = [{transform_indices = @transform_0, window_bounds = array<i64: 128, 128>}, {transform_indices = @transform_1, window_bounds = array<i64: 128, 128>}, {transform_indices = @transform_2, window_bounds = array<i64: 128, 1>}, {transform_indices = @transform_3, window_bounds = array<i64: 1, 128>}, {transform_indices = @transform_4, window_bounds = array<i64: 128, 1>}, {transform_indices = @transform_5, window_bounds = array<i64: 128, 1>}]} {
    %c128_i32 = arith.constant 128 : i32
    %0 = arith.muli %arg0, %c128_i32 : i32
    %c128_i32_0 = arith.constant 128 : i32
    %1 = arith.muli %arg1, %c128_i32_0 : i32
    %c0_i32 = arith.constant 0 : i32
    %2 = arith.cmpi eq, %arg1, %c0_i32 : i32
    %3 = arith.extui %2 : i1 to i32
    %c0_i32_1 = arith.constant 0 : i32
    %4 = arith.cmpi ne, %3, %c0_i32_1 : i32
    scf.if %4 {
      %cst_16 = arith.constant 0xFF800000 : f32
      %28 = vector.broadcast %cst_16 : f32 to vector<128x1xf32>
      %c0_17 = arith.constant 0 : index
      %c0_18 = arith.constant 0 : index
      %29 = vector.load %arg8[%c0_17, %c0_18] : memref<128x1xf32, #tpu.memory_space<vmem>>, vector<128x1xf32>
      tpu.vector_store %arg8[%c0_17, %c0_18], %28 {strides = array<i32>} : memref<128x1xf32, #tpu.memory_space<vmem>>, vector<128x1xf32>,
      %cst_19 = arith.constant 0.000000e+00 : f32
      %30 = vector.broadcast %cst_19 : f32 to vector<128x1xf32>
      %c0_20 = arith.constant 0 : index
      %c0_21 = arith.constant 0 : index
      %31 = vector.load %arg9[%c0_20, %c0_21] : memref<128x1xf32, #tpu.memory_space<vmem>>, vector<128x1xf32>
      tpu.vector_store %arg9[%c0_20, %c0_21], %30 {strides = array<i32>} : memref<128x1xf32, #tpu.memory_space<vmem>>, vector<128x1xf32>,
      %cst_22 = arith.constant 0.000000e+00 : f32
      %32 = vector.broadcast %cst_22 : f32 to vector<128x1xf32>
      %c0_23 = arith.constant 0 : index
      %c0_24 = arith.constant 0 : index
      %33 = vector.load %arg10[%c0_23, %c0_24] : memref<128x1xf32, #tpu.memory_space<vmem>>, vector<128x1xf32>
      tpu.vector_store %arg10[%c0_23, %c0_24], %32 {strides = array<i32>} : memref<128x1xf32, #tpu.memory_space<vmem>>, vector<128x1xf32>,
      %cst_25 = arith.constant 0.000000e+00 : f32
      %34 = vector.broadcast %cst_25 : f32 to vector<128x1xf32>
      %c0_26 = arith.constant 0 : index
      %c0_27 = arith.constant 0 : index
      %35 = vector.load %arg11[%c0_26, %c0_27] : memref<128x1xf32, #tpu.memory_space<vmem>>, vector<128x1xf32>
      tpu.vector_store %arg11[%c0_26, %c0_27], %34 {strides = array<i32>} : memref<128x1xf32, #tpu.memory_space<vmem>>, vector<128x1xf32>,
    } else {
    }
    %c0 = arith.constant 0 : index
    %c0_2 = arith.constant 0 : index
    %5 = vector.load %arg2[%c0, %c0_2] : memref<128x128xf32, #tpu.memory_space<vmem>>, vector<128x128xf32>
    %c0_3 = arith.constant 0 : index
    %c0_4 = arith.constant 0 : index
    %6 = vector.load %arg3[%c0_3, %c0_4] : memref<128x128xf32, #tpu.memory_space<vmem>>, vector<128x128xf32>
    %cst = arith.constant dense<0.000000e+00> : vector<128x128xf32>
    %7 = tpu.matmul %5, %6, %cst {dimension_numbers = #tpu.dot_dimension_numbers<[1], [0], [0], [1], [0, 0, 1, 1], [], []>, precision = #tpu.contract_precision<fp32>} : vector<128x128xf32>, vector<128x128xf32>, vector<128x128xf32> -> vector<128x128xf32>
    %c0_5 = arith.constant 0 : index
    %c0_6 = arith.constant 0 : index
    %8 = vector.load %arg4[%c0_5, %c0_6] : memref<128x1xi32, #tpu.memory_space<vmem>>, vector<128x1xi32>
    %c0_7 = arith.constant 0 : index
    %c0_8 = arith.constant 0 : index
    %9 = vector.load %arg5[%c0_7, %c0_8] : memref<1x128xi32, #tpu.memory_space<vmem>>, vector<1x128xi32>
    %10 = vector.broadcast %8 : vector<128x1xi32> to vector<128x128xi32>
    %11 = vector.broadcast %9 : vector<1x128xi32> to vector<128x128xi32>
    %12 = arith.cmpi eq, %10, %11 : vector<128x128xi32>
    %c128_i32_9 = arith.constant 128 : i32
    %13 = arith.addi %1, %c128_i32_9 : i32
    %14 = arith.cmpi slt, %0, %13 : i32
    %c128_i32_10 = arith.constant 128 : i32
    %15 = arith.addi %0, %c128_i32_10 : i32
    %16 = arith.cmpi slt, %1, %15 : i32
    %17 = arith.andi %14, %16 : i1
    %c0_i32_11 = arith.constant 0 : i32
    %18 = arith.cmpi eq, %arg1, %c0_i32_11 : i32
    %19 = arith.ori %17, %18 : i1
    %20 = arith.extui %19 : i1 to i32
    %c0_i32_12 = arith.constant 0 : i32
    %21 = arith.cmpi ne, %20, %c0_i32_12 : i32
    scf.if %21 {
      %28 = tpu.iota {dimensions = array<i32: 0>} : vector<128x1xi32>
      %29 = vector.broadcast %0 : i32 to vector<128x1xi32>
      %30 = arith.addi %29, %28 : vector<128x1xi32>
      %31 = tpu.iota {dimensions = array<i32: 1>} : vector<1x128xi32>
      %32 = vector.broadcast %1 : i32 to vector<1x128xi32>
      %33 = arith.addi %32, %31 : vector<1x128xi32>
      %34 = vector.broadcast %30 : vector<128x1xi32> to vector<128x128xi32>
      %35 = vector.broadcast %33 : vector<1x128xi32> to vector<128x128xi32>
      %36 = arith.cmpi ne, %34, %35 : vector<128x128xi32>
      %c8_i32 = arith.constant 8 : i32
      %37 = vector.broadcast %c8_i32 : i32 to vector<1x128xi32>
      %38 = arith.cmpi slt, %33, %37 : vector<1x128xi32>
      %39 = vector.broadcast %38 : vector<1x128xi1> to vector<128x128xi1>
      %40 = arith.andi %36, %39 : vector<128x128xi1>
      %cst_16 = arith.constant 0xFF800000 : f32
      %41 = vector.broadcast %cst_16 : f32 to vector<128x128xf32>
      %42 = arith.select %40, %7, %41 : vector<128x128xi1>, vector<128x128xf32>
      %43 = arith.andi %40, %12 : vector<128x128xi1>
      %44 = arith.extui %43 : vector<128x128xi1> to vector<128x128xi32>
      %45 = arith.sitofp %44 : vector<128x128xi32> to vector<128x128xf32>
      %cst_17 = arith.constant dense<0xFF800000> : vector<128xf32>
      %46 = vector.multi_reduction <maximumf>, %42, %cst_17 [1] : vector<128x128xf32> to vector<128xf32>
      %47 = vector.shape_cast %46 : vector<128xf32> to vector<128x1xf32>
      %c0_18 = arith.constant 0 : index
      %c0_19 = arith.constant 0 : index
      %48 = vector.load %arg8[%c0_18, %c0_19] : memref<128x1xf32, #tpu.memory_space<vmem>>, vector<128x1xf32>
      %49 = arith.maximumf %48, %47 : vector<128x1xf32>
      %50 = arith.subf %48, %49 : vector<128x1xf32>
      %51 = math.exp %50 : vector<128x1xf32>
      %52 = vector.broadcast %49 : vector<128x1xf32> to vector<128x128xf32>
      %53 = arith.subf %42, %52 : vector<128x128xf32>
      %54 = math.exp %53 : vector<128x128xf32>
      %c0_20 = arith.constant 0 : index
      %c0_21 = arith.constant 0 : index
      %55 = vector.load %arg9[%c0_20, %c0_21] : memref<128x1xf32, #tpu.memory_space<vmem>>, vector<128x1xf32>
      %56 = arith.mulf %55, %51 : vector<128x1xf32>
      %cst_22 = arith.constant dense<0.000000e+00> : vector<128xf32>
      %57 = vector.multi_reduction <add>, %54, %cst_22 [1] : vector<128x128xf32> to vector<128xf32>
      %58 = vector.shape_cast %57 : vector<128xf32> to vector<128x1xf32>
      %59 = arith.addf %56, %58 : vector<128x1xf32>
      %c0_23 = arith.constant 0 : index
      %c0_24 = arith.constant 0 : index
      %60 = vector.load %arg9[%c0_23, %c0_24] : memref<128x1xf32, #tpu.memory_space<vmem>>, vector<128x1xf32>
      tpu.vector_store %arg9[%c0_23, %c0_24], %59 {strides = array<i32>} : memref<128x1xf32, #tpu.memory_space<vmem>>, vector<128x1xf32>,
      %c0_25 = arith.constant 0 : index
      %c0_26 = arith.constant 0 : index
      %61 = vector.load %arg8[%c0_25, %c0_26] : memref<128x1xf32, #tpu.memory_space<vmem>>, vector<128x1xf32>
      tpu.vector_store %arg8[%c0_25, %c0_26], %49 {strides = array<i32>} : memref<128x1xf32, #tpu.memory_space<vmem>>, vector<128x1xf32>,
      %c0_27 = arith.constant 0 : index
      %c0_28 = arith.constant 0 : index
      %62 = vector.load %arg10[%c0_27, %c0_28] : memref<128x1xf32, #tpu.memory_space<vmem>>, vector<128x1xf32>
      %63 = arith.mulf %45, %7 : vector<128x128xf32>
      %cst_29 = arith.constant dense<0.000000e+00> : vector<128xf32>
      %64 = vector.multi_reduction <add>, %63, %cst_29 [1] : vector<128x128xf32> to vector<128xf32>
      %65 = vector.shape_cast %64 : vector<128xf32> to vector<128x1xf32>
      %66 = arith.addf %62, %65 : vector<128x1xf32>
      %c0_30 = arith.constant 0 : index
      %c0_31 = arith.constant 0 : index
      %67 = vector.load %arg10[%c0_30, %c0_31] : memref<128x1xf32, #tpu.memory_space<vmem>>, vector<128x1xf32>
      tpu.vector_store %arg10[%c0_30, %c0_31], %66 {strides = array<i32>} : memref<128x1xf32, #tpu.memory_space<vmem>>, vector<128x1xf32>,
      %c0_32 = arith.constant 0 : index
      %c0_33 = arith.constant 0 : index
      %68 = vector.load %arg11[%c0_32, %c0_33] : memref<128x1xf32, #tpu.memory_space<vmem>>, vector<128x1xf32>
      %cst_34 = arith.constant dense<0.000000e+00> : vector<128xf32>
      %69 = vector.multi_reduction <add>, %45, %cst_34 [1] : vector<128x128xf32> to vector<128xf32>
      %70 = vector.shape_cast %69 : vector<128xf32> to vector<128x1xf32>
      %71 = arith.addf %68, %70 : vector<128x1xf32>
      %c0_35 = arith.constant 0 : index
      %c0_36 = arith.constant 0 : index
      %72 = vector.load %arg11[%c0_35, %c0_36] : memref<128x1xf32, #tpu.memory_space<vmem>>, vector<128x1xf32>
      tpu.vector_store %arg11[%c0_35, %c0_36], %71 {strides = array<i32>} : memref<128x1xf32, #tpu.memory_space<vmem>>, vector<128x1xf32>,
    } else {
    }
    %true = arith.constant true
    %22 = arith.xori %19, %true : i1
    %23 = arith.extui %22 : i1 to i32
    %c0_i32_13 = arith.constant 0 : i32
    %24 = arith.cmpi ne, %23, %c0_i32_13 : i32
    scf.if %24 {
      %28 = arith.extui %12 : vector<128x128xi1> to vector<128x128xi32>
      %29 = arith.sitofp %28 : vector<128x128xi32> to vector<128x128xf32>
      %cst_16 = arith.constant dense<0xFF800000> : vector<128xf32>
      %30 = vector.multi_reduction <maximumf>, %7, %cst_16 [1] : vector<128x128xf32> to vector<128xf32>
      %31 = vector.shape_cast %30 : vector<128xf32> to vector<128x1xf32>
      %c0_17 = arith.constant 0 : index
      %c0_18 = arith.constant 0 : index
      %32 = vector.load %arg8[%c0_17, %c0_18] : memref<128x1xf32, #tpu.memory_space<vmem>>, vector<128x1xf32>
      %33 = arith.maximumf %32, %31 : vector<128x1xf32>
      %34 = arith.subf %32, %33 : vector<128x1xf32>
      %35 = math.exp %34 : vector<128x1xf32>
      %36 = vector.broadcast %33 : vector<128x1xf32> to vector<128x128xf32>
      %37 = arith.subf %7, %36 : vector<128x128xf32>
      %38 = math.exp %37 : vector<128x128xf32>
      %c0_19 = arith.constant 0 : index
      %c0_20 = arith.constant 0 : index
      %39 = vector.load %arg9[%c0_19, %c0_20] : memref<128x1xf32, #tpu.memory_space<vmem>>, vector<128x1xf32>
      %40 = arith.mulf %39, %35 : vector<128x1xf32>
      %cst_21 = arith.constant dense<0.000000e+00> : vector<128xf32>
      %41 = vector.multi_reduction <add>, %38, %cst_21 [1] : vector<128x128xf32> to vector<128xf32>
      %42 = vector.shape_cast %41 : vector<128xf32> to vector<128x1xf32>
      %43 = arith.addf %40, %42 : vector<128x1xf32>
      %c0_22 = arith.constant 0 : index
      %c0_23 = arith.constant 0 : index
      %44 = vector.load %arg9[%c0_22, %c0_23] : memref<128x1xf32, #tpu.memory_space<vmem>>, vector<128x1xf32>
      tpu.vector_store %arg9[%c0_22, %c0_23], %43 {strides = array<i32>} : memref<128x1xf32, #tpu.memory_space<vmem>>, vector<128x1xf32>,
      %c0_24 = arith.constant 0 : index
      %c0_25 = arith.constant 0 : index
      %45 = vector.load %arg8[%c0_24, %c0_25] : memref<128x1xf32, #tpu.memory_space<vmem>>, vector<128x1xf32>
      tpu.vector_store %arg8[%c0_24, %c0_25], %33 {strides = array<i32>} : memref<128x1xf32, #tpu.memory_space<vmem>>, vector<128x1xf32>,
      %c0_26 = arith.constant 0 : index
      %c0_27 = arith.constant 0 : index
      %46 = vector.load %arg10[%c0_26, %c0_27] : memref<128x1xf32, #tpu.memory_space<vmem>>, vector<128x1xf32>
      %47 = arith.mulf %29, %7 : vector<128x128xf32>
      %cst_28 = arith.constant dense<0.000000e+00> : vector<128xf32>
      %48 = vector.multi_reduction <add>, %47, %cst_28 [1] : vector<128x128xf32> to vector<128xf32>
      %49 = vector.shape_cast %48 : vector<128xf32> to vector<128x1xf32>
      %50 = arith.addf %46, %49 : vector<128x1xf32>
      %c0_29 = arith.constant 0 : index
      %c0_30 = arith.constant 0 : index
      %51 = vector.load %arg10[%c0_29, %c0_30] : memref<128x1xf32, #tpu.memory_space<vmem>>, vector<128x1xf32>
      tpu.vector_store %arg10[%c0_29, %c0_30], %50 {strides = array<i32>} : memref<128x1xf32, #tpu.memory_space<vmem>>, vector<128x1xf32>,
      %c0_31 = arith.constant 0 : index
      %c0_32 = arith.constant 0 : index
      %52 = vector.load %arg11[%c0_31, %c0_32] : memref<128x1xf32, #tpu.memory_space<vmem>>, vector<128x1xf32>
      %cst_33 = arith.constant dense<0.000000e+00> : vector<128xf32>
      %53 = vector.multi_reduction <add>, %29, %cst_33 [1] : vector<128x128xf32> to vector<128xf32>
      %54 = vector.shape_cast %53 : vector<128xf32> to vector<128x1xf32>
      %55 = arith.addf %52, %54 : vector<128x1xf32>
      %c0_34 = arith.constant 0 : index
      %c0_35 = arith.constant 0 : index
      %56 = vector.load %arg11[%c0_34, %c0_35] : memref<128x1xf32, #tpu.memory_space<vmem>>, vector<128x1xf32>
      tpu.vector_store %arg11[%c0_34, %c0_35], %55 {strides = array<i32>} : memref<128x1xf32, #tpu.memory_space<vmem>>, vector<128x1xf32>,
    } else {
    }
    %c0_i32_14 = arith.constant 0 : i32
    %25 = arith.cmpi eq, %arg1, %c0_i32_14 : i32
    %26 = arith.extui %25 : i1 to i32
    %c0_i32_15 = arith.constant 0 : i32
    %27 = arith.cmpi ne, %26, %c0_i32_15 : i32
    scf.if %27 {
      %c0_16 = arith.constant 0 : index
      %c0_17 = arith.constant 0 : index
      %28 = vector.load %arg11[%c0_16, %c0_17] : memref<128x1xf32, #tpu.memory_space<vmem>>, vector<128x1xf32>
      %c0_18 = arith.constant 0 : index
      %c0_19 = arith.constant 0 : index
      %29 = vector.load %arg8[%c0_18, %c0_19] : memref<128x1xf32, #tpu.memory_space<vmem>>, vector<128x1xf32>
      %c0_20 = arith.constant 0 : index
      %c0_21 = arith.constant 0 : index
      %30 = vector.load %arg9[%c0_20, %c0_21] : memref<128x1xf32, #tpu.memory_space<vmem>>, vector<128x1xf32>
      %31 = math.log %30 : vector<128x1xf32>
      %32 = arith.addf %29, %31 : vector<128x1xf32>
      %c0_22 = arith.constant 0 : index
      %c0_23 = arith.constant 0 : index
      %33 = vector.load %arg10[%c0_22, %c0_23] : memref<128x1xf32, #tpu.memory_space<vmem>>, vector<128x1xf32>
      %34 = arith.mulf %28, %32 : vector<128x1xf32>
      %35 = arith.subf %33, %34 : vector<128x1xf32>
      %cst_24 = arith.constant 1.000000e+00 : f32
      %36 = vector.broadcast %cst_24 : f32 to vector<128x1xf32>
      %37 = arith.maximumf %28, %36 : vector<128x1xf32>
      %cst_25 = arith.constant 1.000000e+00 : f32
      %38 = vector.broadcast %cst_25 : f32 to vector<128x1xf32>
      %39 = arith.addf %28, %38 : vector<128x1xf32>
      %40 = arith.mulf %37, %39 : vector<128x1xf32>
      %41 = arith.divf %35, %40 : vector<128x1xf32>
      %cst_26 = arith.constant 1.000000e+00 : f32
      %42 = vector.broadcast %cst_26 : f32 to vector<128x1xf32>
      %43 = arith.addf %28, %42 : vector<128x1xf32>
      %cst_27 = arith.constant 1.000000e+00 : f32
      %44 = vector.broadcast %cst_27 : f32 to vector<128x1xf32>
      %45 = arith.divf %44, %43 : vector<128x1xf32>
      %46 = tpu.iota {dimensions = array<i32: 0>} : vector<128x1xi32>
      %47 = vector.broadcast %0 : i32 to vector<128x1xi32>
      %48 = arith.addi %47, %46 : vector<128x1xi32>
      %c8_i32 = arith.constant 8 : i32
      %49 = vector.broadcast %c8_i32 : i32 to vector<128x1xi32>
      %50 = arith.cmpi slt, %48, %49 : vector<128x1xi32>
      %cst_28 = arith.constant 0.000000e+00 : f32
      %51 = vector.broadcast %cst_28 : f32 to vector<128x1xf32>
      %52 = arith.select %50, %41, %51 : vector<128x1xi1>, vector<128x1xf32>
      %cst_29 = arith.constant 0.000000e+00 : f32
      %53 = vector.broadcast %cst_29 : f32 to vector<128x1xf32>
      %54 = arith.select %50, %45, %53 : vector<128x1xi1>, vector<128x1xf32>
      %c0_30 = arith.constant 0 : index
      %c0_31 = arith.constant 0 : index
      %55 = vector.load %arg6[%c0_30, %c0_31] : memref<128x1xf32, #tpu.memory_space<vmem>>, vector<128x1xf32>
      tpu.vector_store %arg6[%c0_30, %c0_31], %52 {strides = array<i32>} : memref<128x1xf32, #tpu.memory_space<vmem>>, vector<128x1xf32>,
      %c0_32 = arith.constant 0 : index
      %c0_33 = arith.constant 0 : index
      %56 = vector.load %arg7[%c0_32, %c0_33] : memref<128x1xf32, #tpu.memory_space<vmem>>, vector<128x1xf32>
      tpu.vector_store %arg7[%c0_32, %c0_33], %54 {strides = array<i32>} : memref<128x1xf32, #tpu.memory_space<vmem>>, vector<128x1xf32>,
    } else {
    }
    return
  }
  func.func @transform_0(%arg0: i32, %arg1: i32) -> (i32, i32) {
    %c0_i32 = arith.constant 0 : i32
    %c0_i32_0 = arith.constant 0 : i32
    return %arg0, %c0_i32 : i32, i32
  }
  func.func @transform_1(%arg0: i32, %arg1: i32) -> (i32, i32) {
    %c0_i32 = arith.constant 0 : i32
    %c0_i32_0 = arith.constant 0 : i32
    return %c0_i32, %arg1 : i32, i32
  }
  func.func @transform_2(%arg0: i32, %arg1: i32) -> (i32, i32) {
    %c0_i32 = arith.constant 0 : i32
    %c0_i32_0 = arith.constant 0 : i32
    return %arg0, %c0_i32 : i32, i32
  }
  func.func @transform_3(%arg0: i32, %arg1: i32) -> (i32, i32) {
    %c0_i32 = arith.constant 0 : i32
    %c0_i32_0 = arith.constant 0 : i32
    return %c0_i32, %arg1 : i32, i32
  }
  func.func @transform_4(%arg0: i32, %arg1: i32) -> (i32, i32) {
    %c0_i32 = arith.constant 0 : i32
    %c0_i32_0 = arith.constant 0 : i32
    return %arg0, %c0_i32 : i32, i32
  }
  func.func @transform_5(%arg0: i32, %arg1: i32) -> (i32, i32) {
    %c0_i32 = arith.constant 0 : i32
    %c0_i32_0 = arith.constant 0 : i32
    return %arg0, %c0_i32 : i32, i32
  }
}

</mosaic_0001>

<bundles_post_ra>
// kernel: tpu_custom_call.1
= control target key start
LH: loop header
LB: loop body
LE: loop exit
PB: predicated region body
PF: predicated region fallthrough
CT: control target
= control target key end

     0   :  { %11 = vsyncpa [#allocation7], 0  ;;  %s5710_s0 = inlined_call_operand.hbm [shape: f32[128,128], index: 0, kind: input, shape index: {}]   ;;  %s5711_s1 = inlined_call_operand.hbm [shape: f32[128,128], index: 1, kind: input, shape index: {}]   ;;  %s5712_s2 = inlined_call_operand.hbm [shape: s32[128,1], index: 2, kind: input, shape index: {}]   ;;  %s5713_s3 = inlined_call_operand.hbm [shape: s32[1,128], index: 3, kind: input, shape index: {}]   ;;  %s5714_s4 = inlined_call_operand.hbm [shape: f32[128,1], index: 4, kind: output, shape index: {0}]   ;;  %s5715_s5 = inlined_call_operand.hbm [shape: f32[128,1], index: 5, kind: output, shape index: {1}]  }
   0x1   :  { %12 = vsyncpa [#allocation10], 0 }
   0x2   :  { %13 = vsyncpa [#allocation13], 0 }
   0x3   :  { %14 = vsyncpa [#allocation8], 0 }
   0x4   :  { %15 = vsyncpa [#allocation16], 0  ;;  %s4255_s18 = smov [#allocation9]   ;;  %s4256_s20 = smov [#allocation6]  }
   0x5   :  { %s33_s19 = sshll.u32 %s4255_s18, 4  ;;  %s21_s21 = sshll.u32 %s4256_s20, 4  ;;  %s34_s19 = int_to_ptr.vmem [resolvable:$true] %s33_s19  ;;  %s4296_s21 = int_to_ptr.vmem [resolvable:$true] %s21_s21 }
   0x6   :  { %s4113_s24 = scalar_lea.hbm %s5711_s1, 2048 }
   0x7   :  { %p4114_p0 = scmp.ne.s32.totalorder %s5711_s1, %s4113_s24  ;;  %p4117_p1 = scmp.lt.u32.totalorder %s4113_s24, %s5711_s1 }
   0x9   :  { %p4119_p2 = pnand %p4117_p1, %p4114_p0 }
   0xb   :  { %4122 = shalt.err (!%p4119_p2)
}
   0xc   :  { %s4123_s29 = scalar_lea.vmem %s34_s19, 2048  ;;  %p4128_p4 = scmp.lt.s32.totalorder %s34_s19, %s34_s19 }
   0xd   :  { %p4124_p3 = scmp.ne.s32.totalorder %s34_s19, %s4123_s29  ;;  %p4129_p5 = scmp.lt.s32.totalorder %s4123_s29, %s4123_s29 }
   0xf   :  { %p4130_p6 = por %p4129_p5, %p4128_p4 }
  0x11   :  { %p4131_p7 = pnand %p4130_p6, %p4124_p3 }
  0x13   :  { %4134 = shalt.err (!%p4131_p7)
}
  0x14   :  { %s4257_s30 = smov 128   ;;  %s4258_s6 = smov 8  }
  0x15   :  { %39 = dma.hbm_to_vmem [thread:$0]  %s5711_s1, 2048, %s34_s19, [#allocation10], %s4257_s30, %s4257_s30, %s4258_s6  }
  0x16   :  { %s4135_s11 = scalar_lea.hbm %s5710_s0, 2048 }
  0x17   :  { %p4136_p8 = scmp.ne.s32.totalorder %s5710_s0, %s4135_s11  ;;  %p4139_p9 = scmp.lt.u32.totalorder %s4135_s11, %s5710_s0 }
  0x19   :  { %p4141_p10 = pnand %p4139_p9, %p4136_p8 }
  0x1b   :  { %4144 = shalt.err (!%p4141_p10)
}
  0x1c   :  { %s4145_s16 = scalar_lea.vmem %s4296_s21, 2048  ;;  %p4150_p12 = scmp.lt.s32.totalorder %s4296_s21, %s4296_s21 }
  0x1d   :  { %p4146_p11 = scmp.ne.s32.totalorder %s4296_s21, %s4145_s16  ;;  %p4151_p13 = scmp.lt.s32.totalorder %s4145_s16, %s4145_s16 }
  0x1f   :  { %p4152_p0 = por %p4151_p13, %p4150_p12 }
  0x21   :  { %p4153_p1 = pnand %p4152_p0, %p4146_p11 }
  0x23   :  { %4156 = shalt.err (!%p4153_p1)
}
  0x24   :  { %27 = dma.hbm_to_vmem [thread:$0]  %s5710_s0, 2048, %s4296_s21, [#allocation7], %s4257_s30, %s4257_s30, %s4258_s6  }
  0x25   :  { %s4259_s18 = smov [#allocation11]   ;;  %s4260_s20 = smov [#allocation12]  }
  0x26   :  { %s45_s19 = sshll.u32 %s4259_s18, 4  ;;  %s58_s22 = sshll.u32 %s4260_s20, 4  ;;  %s46_s19 = int_to_ptr.vmem [resolvable:$true] %s45_s19  ;;  %s59_s22 = int_to_ptr.vmem [resolvable:$true] %s58_s22 }
  0x27   :  { %s4157_s25 = scalar_lea.hbm %s5712_s2, 2048 }
  0x28   :  { %p4158_p2 = scmp.ne.s32.totalorder %s5712_s2, %s4157_s25  ;;  %p4161_p3 = scmp.lt.u32.totalorder %s4157_s25, %s5712_s2 }
  0x2a   :  { %p4163_p4 = pnand %p4161_p3, %p4158_p2 }
  0x2c   :  { %4166 = shalt.err (!%p4163_p4)
}
  0x2d   :  { %s4167_s0 = scalar_lea.vmem %s46_s19, 2048  ;;  %p4172_p6 = scmp.lt.s32.totalorder %s46_s19, %s46_s19 }
  0x2e   :  { %p4168_p5 = scmp.ne.s32.totalorder %s46_s19, %s4167_s0  ;;  %p4173_p7 = scmp.lt.s32.totalorder %s4167_s0, %s4167_s0 }
  0x30   :  { %p4174_p8 = por %p4173_p7, %p4172_p6 }
  0x32   :  { %p4175_p9 = pnand %p4174_p8, %p4168_p5 }
  0x34   :  { %4178 = shalt.err (!%p4175_p9)
}
  0x35   :  { %51 = dma.hbm_to_vmem [thread:$0]  %s5712_s2, 2048, %s46_s19, [#allocation10], %s4257_s30, %s4257_s30, %s4258_s6  }
  0x36   :  { %s4179_s10 = scalar_lea.hbm %s5713_s3, 16 }
  0x37   :  { %p4180_p10 = scmp.ne.s32.totalorder %s5713_s3, %s4179_s10  ;;  %p4183_p11 = scmp.lt.u32.totalorder %s4179_s10, %s5713_s3 }
  0x39   :  { %p4185_p12 = pnand %p4183_p11, %p4180_p10 }
  0x3b   :  { %4188 = shalt.err (!%p4185_p12)
}
  0x3c   :  { %s4189_s15 = scalar_lea.vmem %s59_s22, 16  ;;  %s4193_s16 = scalar_lea.vmem %s59_s22, 32 }
  0x3d   :  { %p4190_p13 = scmp.ne.s32.totalorder %s59_s22, %s4189_s15  ;;  %p4194_p0 = scmp.lt.s32.totalorder %s59_s22, %s59_s22 }
  0x3e   :  { %p4195_p1 = scmp.lt.s32.totalorder %s4193_s16, %s4189_s15 }
  0x40   :  { %p4196_p2 = por %p4195_p1, %p4194_p0 }
  0x42   :  { %p4197_p3 = pnand %p4196_p2, %p4190_p13 }
  0x44   :  { %4200 = shalt.err (!%p4197_p3)
}
  0x45   :  { %61 = dma.hbm_to_vmem [thread:$0]  %s5713_s3, 16, %s59_s22, [#allocation13]  }
  0x46   :  { %4245 = dma.done.wait [#allocation7], 2048  }
  0x47   :  { %4246 = vsyncadd [#allocation7], 4294965248 }
  0x48   :  { %4247 = dma.done.wait [#allocation10], 4096  }
  0x49   :  { %4248 = vsyncadd [#allocation10], 4294963200 }
  0x4a   :  { %4249 = dma.done.wait [#allocation13], 16  }
  0x4b   :  { %4250 = vsyncadd [#allocation13], 4294967280  ;;  %v161_v0 = vld [vmem:[#allocation9] sm:$0xff]  ;;  %v162_v1 = vld [vmem:[#allocation9 + $0x8] sm:$0xff]  ;;  %vm80_vm5 = vcmask 7168   ;;  %s4264_s3 = smov [#allocation15]  }
  0x4c   :  { %v163_v2 = vld [vmem:[#allocation9 + $0x10] sm:$0xff]  ;;  %v178_v3 = vand.u32 4294901760, %v161_v0  ;;  %v181_v4 = vand.u32 4294901760, %v162_v1  ;;  %v164_v5 = vld [vmem:[#allocation9 + $0x18] sm:$0xff]  ;;  %v4360_v7 = vld [vmem:[#allocation9 + $0x20] sm:$0xff]  ;;  %s3179_s17 = sshll.u32 %s4264_s3, 4  ;;  %s3180_s17 = int_to_ptr.vmem [resolvable:$true] %s3179_s17 }
  0x4d   :  { %v184_v6 = vand.u32 4294901760, %v163_v2  ;;  %v4362_v8 = vld [vmem:[#allocation9 + $0x28] sm:$0xff]  ;;  %v187_v9 = vand.u32 4294901760, %v164_v5  ;;  %v190_v11 = vand.u32 4294901760, %v4360_v7  ;;  %v4370_v14 = vld [vmem:[#allocation9 + $0x30] sm:$0xff]  ;;  %v4372_v15 = vld [vmem:[#allocation9 + $0x38] sm:$0xff]  ;;  %p4206_p5 = scmp.lt.s32.totalorder %s3180_s17, %s3180_s17 }
  0x4e   :  { %v4364_v10 = vpack.c.bf16 %v181_v4, %v178_v3  ;;  %v193_v12 = vand.u32 4294901760, %v4362_v8  ;;  %v145_v16 = vld [vmem:[#allocation6] sm:$0xff]  ;;  %v196_v19 = vand.u32 4294901760, %v4370_v14  ;;  %v199_v20 = vand.u32 4294901760, %v4372_v15  ;;  %v146_v21 = vld [vmem:[#allocation6 + $0x8] sm:$0xff]  ;;  %v4412_v30 = vld [vmem:[#allocation9 + $0x50] sm:$0xff] }
  0x4f   :  { %v4368_v13 = vpack.c.bf16 %v187_v9, %v184_v6  ;;  %v4378_v17 = vand.u32 4294901760, %v145_v16  ;;  %v4390_v22 = vld [vmem:[#allocation9 + $0x40] sm:$0xff]  ;;  %v4392_v23 = vld [vmem:[#allocation9 + $0x48] sm:$0xff]  ;;  %v4400_v26 = vand.u32 4294901760, %v146_v21  ;;  %v147_v31 = vld [vmem:[#allocation6 + $0x10] sm:$0xff]  ;;  %v4417_v35 = vsub.f32 %v161_v0, %v178_v3  ;;  %s4201_s18 = scalar_lea.vmem %s3180_s17, 2048 }
  0x50   :  { %3759 = vmatprep.subr.bf16.mxu1 %v4364_v10  ;;  %3855 = vmatprep.subr.bf16.mxu0 %v4364_v10  ;;  %v4386_v18 = vpack.c.bf16 %v193_v12, %v190_v11  ;;  %v4408_v27 = vpack.c.bf16 %v199_v20, %v196_v19  ;;  %v5726_v28 = vand.u32 4294901760, %v4390_v22  ;;  %v5724_v29 = vand.u32 4294901760, %v4392_v23  ;;  %v4414_v32 = vld [vmem:[#allocation9 + $0x58] sm:$0xff]  ;;  %v4424_v38 = vld [vmem:[#allocation9 + $0x60] sm:$0xff]  ;;  %v4426_v39 = vld [vmem:[#allocation9 + $0x68] sm:$0xff]  ;;  %p4202_p4 = scmp.ne.s32.totalorder %s3180_s17, %s4201_s18  ;;  %p4207_p6 = scmp.lt.s32.totalorder %s4201_s18, %s4201_s18 }
  0x51   :  { %3761 = vmatpush3.bf16.msra.mxu1 %v4364_v10  ;;  %3857 = vmatpush3.bf16.msra.mxu0 %v4364_v10  ;;  %v4395_v24 = vsub.f32 %v145_v16, %v4378_v17  ;;  %v148_v34 = vld [vmem:[#allocation6 + $0x18] sm:$0xff]  ;;  %v4419_v36 = vsub.f32 %v162_v1, %v181_v4  ;;  %v5723_v37 = vand.u32 4294901760, %v4412_v30  ;;  %v4429_v41 = vsub.f32 %v146_v21, %v4400_v26  ;;  %v4442_v45 = vld [vmem:[#allocation9 + $0x70] sm:$0xff]  ;;  %v149_v50 = vld [vmem:[#allocation6 + $0x20] sm:$0xff] }
  0x52   :  { %3763 = vmatprep.subr.bf16.mxu1 %v4368_v13  ;;  %3859 = vmatprep.subr.bf16.mxu0 %v4368_v13  ;;  %5780 = vst [vmem:[#allocation23_spill] sm:$0xff] %v4408_v27  ;;  %v4431_v42 = vand.u32 4294901760, %v147_v31  ;;  %v4439_v43 = vpack.c.bf16 %v5724_v29, %v5726_v28  ;;  %v5721_v44 = vand.u32 4294901760, %v4414_v32  ;;  %v4444_v46 = vld [vmem:[#allocation9 + $0x78] sm:$0xff]  ;;  %v4446_v47 = vand.u32 4294901760, %v148_v34  ;;  %v150_v55 = vld [vmem:[#allocation6 + $0x28] sm:$0xff]  ;;  %p4208_p7 = por %p4207_p6, %p4206_p5 }
  0x53   :  { %5779 = vst [vmem:[#allocation22_spill] sm:$0xff] %v4395_v24  ;;  %v260_v25 = vand.u32 4294901760, %v4395_v24  ;;  %5781 = vst [vmem:[#allocation24_spill] sm:$0xff] %v4429_v41  ;;  %v4448_v48 = vsub.f32 %v163_v2, %v184_v6  ;;  %v4450_v49 = vsub.f32 %v164_v5, %v187_v9  ;;  %v5719_v51 = vand.u32 4294901760, %v4424_v38  ;;  %v151_v2 = vld [vmem:[#allocation6 + $0x30] sm:$0xff]  ;;  %v152_v9 = vld [vmem:[#allocation6 + $0x38] sm:$0xff] }
  0x54   :  { %5782 = vst [vmem:[#allocation25_spill] sm:$0xff] %v4439_v43  ;;  %v5718_v52 = vand.u32 4294901760, %v4426_v39  ;;  %v421_v53 = vand.u32 4294901760, %v4417_v35  ;;  %v428_v54 = vand.u32 4294901760, %v4419_v36  ;;  %v5717_v56 = vand.u32 4294901760, %v4442_v45  ;;  %p4209_p8 = pnand %p4208_p7, %p4202_p4 }
  0x55   :  { %3765 = vmatpush3.bf16.msra.mxu1 %v4368_v13  ;;  %3861 = vmatpush3.bf16.msra.mxu0 %v4368_v13  ;;  %v261_v33 = vsub.f32 %v4395_v24, %v260_v25  ;;  %v5716_v57 = vand.u32 4294901760, %v4444_v46  ;;  %v5720_v58 = vand.u32 4294901760, %v4429_v41  ;;  %v4462_v59 = vsub.f32 %v147_v31, %v4431_v42 }
  0x56   :  { %3767 = vmatprep.subr.bf16.mxu1 %v4386_v18  ;;  %3863 = vmatprep.subr.bf16.mxu0 %v4386_v18  ;;  %v4470_v60 = vpack.c.bf16 %v5721_v44, %v5723_v37  ;;  %v4473_v61 = vsub.f32 %v148_v34, %v4446_v47  ;;  %v435_v62 = vand.u32 4294901760, %v4448_v48  ;;  %v4476_v63 = vand.u32 4294901760, %v149_v50 }
  0x57   :  { %3622 = vmatprep.mubr.f32.mxu0 %v260_v25  ;;  %v262_v40 = vand.u32 4294901760, %v261_v33  ;;  %5783 = vst [vmem:[#allocation26_spill] sm:$0xff] %v4462_v59  ;;  %v442_v0 = vand.u32 4294901760, %v4450_v49  ;;  %v4479_v1 = vand.u32 4294901760, %v150_v55  ;;  %v422_v3 = vsub.f32 %v4417_v35, %v421_v53 }
  0x58   :  { %5784 = vst [vmem:[#allocation27_spill] sm:$0xff] %v4470_v60  ;;  %5785 = vst [vmem:[#allocation28_spill] sm:$0xff] %v4473_v61  ;;  %v429_v4 = vsub.f32 %v4419_v36, %v428_v54  ;;  %v4486_v5 = vsub.f32 %v4360_v7, %v190_v11  ;;  %v4491_v6 = vsub.f32 %v4362_v8, %v193_v12  ;;  %v5722_v11 = vand.u32 4294901760, %v4462_v59 }
  0x59   :  { %3769 = vmatpush3.bf16.msra.mxu1 %v4386_v18  ;;  %3865 = vmatpush3.bf16.msra.mxu0 %v4386_v18  ;;  %5786 = vst [vmem:[#allocation29_spill] sm:$0xff] %v4479_v1  ;;  %v4499_v16 = vpack.c.bf16 %v5718_v52, %v5719_v51  ;;  %v4505_v7 = vpack.c.bf16 %v5716_v57, %v5717_v56  ;;  %v5725_v12 = vand.u32 4294901760, %v4473_v61  ;;  %v4520_v31 = vand.u32 4294901760, %v151_v2 }
  0x5a   :  { %3771 = vmatprep.subr.bf16.mxu1 %v4408_v27  ;;  %3867 = vmatprep.subr.bf16.mxu0 %v4408_v27  ;;  %v4510_v8 = vsub.f32 %v4429_v41, %v5720_v58  ;;  %v436_v21 = vsub.f32 %v4448_v48, %v435_v62  ;;  %v4518_v25 = vsub.f32 %v149_v50, %v4476_v63  ;;  %v423_v56 = vand.u32 4294901760, %v422_v3 }
  0x5b   :  { %3454 = vmatprep.mubr.f32.mxu1 %v262_v40  ;;  %5787 = vst [vmem:[#allocation30_spill] sm:$0xff] %v4499_v16  ;;  %5788 = vst [vmem:[#allocation31_spill] sm:$0xff] %v4505_v7  ;;  %v443_v33 = vsub.f32 %v4450_v49, %v442_v0  ;;  %v4524_v34 = vsub.f32 %v150_v55, %v4479_v1  ;;  %v4526_v40 = vand.u32 4294901760, %v152_v9  ;;  %v430_v52 = vand.u32 4294901760, %v429_v4 }
  0x5c   :  { %5789 = vst [vmem:[#allocation32_spill] sm:$0xff] %v4518_v25  ;;  %5790 = vst [vmem:[#allocation33_spill] sm:$0xff] %v4520_v31  ;;  %v4531_v57 = vsub.f32 %v4370_v14, %v196_v19  ;;  %v449_v51 = vand.u32 4294901760, %v4486_v5  ;;  %v456_v50 = vand.u32 4294901760, %v4491_v6  ;;  %v272_v55 = vand.u32 4294901760, %v4510_v8  ;;  %v153_v19 = vld [vmem:[#allocation6 + $0x40] sm:$0xff] }
  0x5d   :  { %3773 = vmatpush3.bf16.msra.mxu1 %v4408_v27  ;;  %3869 = vmatpush3.bf16.msra.mxu0 %v4408_v27  ;;  %5791 = vst [vmem:[#allocation34_spill] sm:$0xff] %v4524_v34  ;;  %5792 = vst [vmem:[#allocation35_spill] sm:$0xff] %v4526_v40  ;;  %v4538_v58 = vpack.c.bf16 %v428_v54, %v421_v53  ;;  %v4543_v44 = vsub.f32 %v4462_v59, %v5722_v11  ;;  %v437_v54 = vand.u32 4294901760, %v436_v21 }
  0x5e   :  { %3775 = vmatprep.subr.bf16.mxu1 %v4439_v43  ;;  %3871 = vmatprep.subr.bf16.mxu0 %v4439_v43  ;;  %v4548_v14 = vsub.f32 %v4372_v15, %v199_v20  ;;  %v4555_v53 = vsub.f32 %v4473_v61, %v5725_v12  ;;  %v5734_v3 = vand.u32 4294901760, %v4518_v25  ;;  %v4559_v4 = vsub.f32 %v151_v2, %v4520_v31 }
  0x5f   :  { %v444_v8 = vand.u32 4294901760, %v443_v33  ;;  %v4563_v20 = vsub.f32 %v152_v9, %v4526_v40  ;;  %v3790_v37 = vpack.c.bf16 %v430_v52, %v423_v56  ;;  %v450_v29 = vsub.f32 %v4486_v5, %v449_v51  ;;  %v154_v33 = vld [vmem:[#allocation6 + $0x48] sm:$0xff] }
  0x60   :  { %5793 = vst [vmem:[#allocation36_spill] sm:$0xff] %v4559_v4  ;;  %v457_v12 = vsub.f32 %v4491_v6, %v456_v50  ;;  %v4568_v28 = vand.u32 4294901760, %v153_v19  ;;  %v282_v2 = vand.u32 4294901760, %v4543_v44  ;;  %v470_v21 = vand.u32 4294901760, %v4548_v14 }
  0x61   :  { %3777 = vmatpush3.bf16.msra.mxu1 %v4439_v43  ;;  %3873 = vmatpush3.bf16.msra.mxu0 %v4439_v43  ;;  %5794 = vst [vmem:[#allocation37_spill] sm:$0xff] %v4563_v20  ;;  %v5796_v9 = vand.u32 4294901760, %v4390_v22  ;;  %v5797_v52 = vand.u32 4294901760, %v4392_v23  ;;  %v292_v15 = vand.u32 4294901760, %v4555_v53  ;;  %v3890_v44 = vpack.c.bf16 %v442_v0, %v435_v62 }
  0x62   :  { %3779 = vmatprep.subr.bf16.mxu1 %v4470_v60  ;;  %3875 = vmatprep.subr.bf16.mxu0 %v4470_v60  ;;  %5795 = vst [vmem:[#allocation38_spill] sm:$0xff] %v4568_v28  ;;  %v4590_v24 = vsub.f32 %v4518_v25, %v5734_v3  ;;  %v5799_v43 = vand.u32 4294901760, %v4531_v57  ;;  %v451_v0 = vand.u32 4294901760, %v450_v29  ;;  %v458_v53 = vand.u32 4294901760, %v457_v12 }
  0x63   :  { %v4577_v11 = vsub.f32 %v4390_v22, %v5796_v9  ;;  %v4582_v56 = vsub.f32 %v4392_v23, %v5797_v52  ;;  %v5743_v22 = vand.u32 4294901760, %v4559_v4  ;;  %v155_v9 = vld [vmem:[#allocation6 + $0x50] sm:$0xff]  ;;  %v4603_v3 = vsub.f32 %v153_v19, %v4568_v28 }
  0x64   :  { %v464_v62 = vsub.f32 %v4531_v57, %v5799_v43  ;;  %v4605_v40 = vand.u32 4294901760, %v154_v33  ;;  %v4612_v52 = vand.u32 4294901760, %v155_v9  ;;  %v156_v43 = vld [vmem:[#allocation6 + $0x58] sm:$0xff]  ;;  %v302_v29 = vand.u32 4294901760, %v4590_v24 }
  0x65   :  { %3781 = vmatpush3.bf16.msra.mxu1 %v4470_v60  ;;  %3877 = vmatpush3.bf16.msra.mxu0 %v4470_v60  ;;  %v5798_v60 = vand.u32 4294901760, %v4524_v34  ;;  %v4616_v12 = vpack.c.bf16 %v456_v50, %v449_v51  ;;  %v4621_v19 = vsub.f32 %v4559_v4, %v5743_v22  ;;  %v5801_v28 = vand.u32 4294901760, %v4563_v20  ;;  %v157_v22 = vld [vmem:[#allocation6 + $0x60] sm:$0xff] }
  0x66   :  { %3783 = vmatprep.subr.bf16.mxu1 %v4499_v16  ;;  %3879 = vmatprep.subr.bf16.mxu0 %v4499_v16  ;;  %v465_v24 = vand.u32 4294901760, %v464_v62  ;;  %v5802_v51 = vand.u32 4294901760, %v4414_v32  ;;  %v5803_v31 = vand.u32 4294901760, %v4429_v41  ;;  %v4645_v1 = vand.u32 4294901760, %v156_v43 }
  0x67   :  { %v4596_v23 = vsub.f32 %v4524_v34, %v5798_v60  ;;  %v471_v60 = vsub.f32 %v4548_v14, %v470_v21  ;;  %v4632_v27 = vsub.f32 %v4563_v20, %v5801_v28 }
  0x68   :  { %v4637_v50 = vsub.f32 %v4414_v32, %v5802_v51  ;;  %v5804_v32 = vand.u32 4294901760, %v4577_v11  ;;  %v5807_v51 = vand.u32 4294901760, %v4424_v38 }
  0x69   :  { %3785 = vmatpush3.bf16.msra.mxu1 %v4499_v16  ;;  %3881 = vmatpush3.bf16.msra.mxu0 %v4499_v16  ;;  %v3794_v16 = vpack.c.bf16 %v444_v8, %v437_v54  ;;  %v312_v8 = vand.u32 4294901760, %v4596_v23  ;;  %v4643_v23 = vsub.f32 %v154_v33, %v4605_v40  ;;  %v472_v28 = vand.u32 4294901760, %v471_v60 }
  0x6a   :  { %3787 = vmatprep.subr.bf16.mxu1 %v4505_v7  ;;  %3883 = vmatprep.subr.bf16.mxu0 %v4505_v7  ;;  %v478_v62 = vsub.f32 %v4577_v11, %v5804_v32  ;;  %v5806_v33 = vand.u32 4294901760, %v4462_v59  ;;  %v4661_v60 = vand.u32 4294901760, %v157_v22  ;;  %v4666_v32 = vsub.f32 %v4424_v38, %v5807_v51 }
  0x6b   :  { %v5810_v59 = vand.u32 4294901760, %v4473_v61  ;;  %v5811_v38 = vand.u32 4294901760, %v4603_v3  ;;  %v160_v61 = vld [vmem:[#allocation6 + $0x78] sm:$0xff] }
  0x6d   :  { %3789 = vmatpush3.bf16.msra.mxu1 %v4505_v7  ;;  %3885 = vmatpush3.bf16.msra.mxu0 %v4505_v7  ;;  %v5800_v7 = vand.u32 4294901760, %v4412_v30  ;;  %v341_v51 = vsub.f32 %v4603_v3, %v5811_v38 }
  0x6e   :  { %3791 = vmatprep.subr.bf16.mxu1 %v3790_v37  ;;  %3887 = vmatprep.subr.bf16.mxu0 %v4538_v58 }
  0x6f   :  { %v4626_v54 = vsub.f32 %v4412_v30, %v5800_v7  ;;  %v3798_v30 = vpack.c.bf16 %v458_v53, %v451_v0  ;;  %v4655_v0 = vsub.f32 %v155_v9, %v4612_v52  ;;  %v158_v53 = vld [vmem:[#allocation6 + $0x68] sm:$0xff]  ;;  %v332_v9 = vand.u32 4294901760, %v4632_v27  ;;  %v159_v7 = vld [vmem:[#allocation6 + $0x70] sm:$0xff] }
  0x70   :  { %3455 = vmatmul.mubr.f32.vlgmr.msra.gmra.mrb[0].mxu1 %v272_v55  ;;  %3623 = vmatmul.mubr.f32.vlgmr.msra.gmra.mrb[0].mxu0 %v5803_v31  ;;  %v5805_v55 = vand.u32 4294901760, %v4582_v56 }
  0x71   :  { %3793 = vmatpush3.bf16.msra.mxu1 %v3790_v37  ;;  %3889 = vmatpush3.bf16.msra.mxu0 %v4538_v58  ;;  %v322_v37 = vand.u32 4294901760, %v4621_v19  ;;  %v5809_v19 = vand.u32 4294901760, %v4426_v39  ;;  %v5814_v38 = vand.u32 4294901760, %v4626_v54 }
  0x72   :  { %v485_v31 = vsub.f32 %v4582_v56, %v5805_v55  ;;  %3457 = vmatprep.mubr.f32.mxu1 %v282_v2  ;;  %3625 = vmatprep.mubr.f32.mxu0 %v5806_v33  ;;  %v5808_v2 = vand.u32 4294901760, %v4531_v57 }
  0x73   :  { %3795 = vmatprep.subr.bf16.mxu1 %v3794_v16  ;;  %3891 = vmatprep.subr.bf16.mxu0 %v3890_v44  ;;  %v4675_v58 = vsub.f32 %v4426_v39, %v5809_v19  ;;  %v3802_v39 = vpack.c.bf16 %v472_v28, %v465_v24  ;;  %v479_v19 = vand.u32 4294901760, %v478_v62  ;;  %v492_v27 = vsub.f32 %v4626_v54, %v5814_v38 }
  0x74   :  { %v3898_v55 = vpack.c.bf16 %v470_v21, %v5808_v2  ;;  %3458 = vmatmul.mubr.f32.gmra.mrb[2].mxu1 %v292_v15  ;;  %3626 = vmatmul.mubr.f32.gmra.mrb[2].mxu0 %v5810_v59  ;;  %v4684_v21 = vsub.f32 %v156_v43, %v4645_v1  ;;  %v4686_v2 = vand.u32 4294901760, %v158_v53  ;;  %v486_v33 = vand.u32 4294901760, %v485_v31 }
  0x75   :  { %3797 = vmatpush3.bf16.msra.mxu1 %v3794_v16  ;;  %3893 = vmatpush3.bf16.msra.mxu0 %v3890_v44  ;;  %v5813_v59 = vand.u32 4294901760, %v4518_v25  ;;  %v4695_v43 = vsub.f32 %v157_v22, %v4661_v60  ;;  %v4698_v44 = vand.u32 4294901760, %v159_v7  ;;  %v5817_v24 = vand.u32 4294901760, %v4637_v50 }
  0x76   :  { %5812 = vst [vmem:[#allocation39_spill] sm:$0xff] %v4684_v21  ;;  %3460 = vmatprep.mubr.f32.mxu1 %v302_v29  ;;  %3799 = vmatprep.subr.bf16.mxu1 %v3798_v30  ;;  %v512_v28 = vand.u32 4294901760, %v4675_v58  ;;  %v5818_v62 = vand.u32 4294901760, %v4442_v45  ;;  %v5819_v22 = vand.u32 4294901760, %v4444_v46  ;;  %v5820_v38 = vand.u32 4294901760, %v4524_v34 }
  0x77   :  { %3628 = vmatprep.mubr.f32.mxu0 %v5813_v59  ;;  %5815 = vst [vmem:[#allocation40_spill] sm:$0xff] %v4695_v43  ;;  %5816 = vst [vmem:[#allocation41_spill] sm:$0xff] %v4698_v44  ;;  %3895 = vmatprep.subr.bf16.mxu0 %v4616_v12  ;;  %v499_v29 = vsub.f32 %v4637_v50, %v5817_v24  ;;  %v5821_v16 = vand.u32 4294901760, %v4643_v23  ;;  %v370_v15 = vand.u32 4294901760, %v4684_v21  ;;  %v5825_v34 = vand.u32 4294901760, %v4655_v0 }
  0x78   :  { %v4708_v31 = vsub.f32 %v4442_v45, %v5818_v62  ;;  %v4713_v59 = vsub.f32 %v4444_v46, %v5819_v22  ;;  %3461 = vmatmul.mubr.f32.gmra.mrb[4].mxu1 %v312_v8  ;;  %3629 = vmatmul.mubr.f32.gmra.mrb[4].mxu0 %v5820_v38  ;;  %v4722_v25 = vsub.f32 %v158_v53, %v4686_v2  ;;  %v4724_v45 = vand.u32 4294901760, %v160_v61 }
  0x79   :  { %v351_v24 = vsub.f32 %v4643_v23, %v5821_v16  ;;  %3801 = vmatpush3.bf16.msra.mxu1 %v3798_v30  ;;  %3897 = vmatpush3.bf16.msra.mxu0 %v4616_v12  ;;  %v342_v46 = vand.u32 4294901760, %v341_v51  ;;  %v3806_v62 = vpack.c.bf16 %v486_v33, %v479_v19  ;;  %v5823_v8 = vand.u32 4294901760, %v4577_v11 }
  0x7a   :  { %5822 = vst [vmem:[#allocation42_spill] sm:$0xff] %v4722_v25  ;;  %v5824_v22 = vand.u32 4294901760, %v4582_v56  ;;  %v361_v16 = vsub.f32 %v4655_v0, %v5825_v34  ;;  %3463 = vmatprep.mubr.f32.mxu1 %v322_v37  ;;  %v5826_v53 = vand.u32 4294901760, %v4559_v4  ;;  %v493_v41 = vand.u32 4294901760, %v492_v27  ;;  %3803 = vmatprep.subr.bf16.mxu1 %v3802_v39 }
  0x7b   :  { %v380_v30 = vand.u32 4294901760, %v4695_v43  ;;  %v5827_v12 = vand.u32 4294901760, %v4666_v32  ;;  %v4741_v51 = vsub.f32 %v159_v7, %v4698_v44  ;;  %3899 = vmatprep.subr.bf16.mxu0 %v3898_v55  ;;  %v500_v19 = vand.u32 4294901760, %v499_v29 }
  0x7c   :  { %v3902_v38 = vpack.c.bf16 %v5824_v22, %v5823_v8  ;;  %3631 = vmatprep.mubr.f32.mxu0 %v5826_v53  ;;  %v513_v8 = vsub.f32 %v4675_v58, %v512_v28  ;;  %v519_v34 = vand.u32 4294901760, %v4708_v31  ;;  %v526_v37 = vand.u32 4294901760, %v4713_v59  ;;  %3464 = vmatmul.mubr.f32.gmra.mrb[6].mxu1 %v332_v9 }
  0x7d   :  { %v506_v33 = vsub.f32 %v4666_v32, %v5827_v12  ;;  %v5828_v27 = vand.u32 4294901760, %v4563_v20  ;;  %v352_v22 = vand.u32 4294901760, %v351_v24  ;;  %v371_v53 = vsub.f32 %v4684_v21, %v370_v15  ;;  %3805 = vmatpush3.bf16.msra.mxu1 %v3802_v39  ;;  %3901 = vmatpush3.bf16.msra.mxu0 %v3898_v55 }
  0x7e   :  { %v390_v12 = vand.u32 4294901760, %v4722_v25  ;;  %v4751_v7 = vsub.f32 %v160_v61, %v4724_v45  ;;  %v362_v29 = vand.u32 4294901760, %v361_v16  ;;  %3466 = vmatprep.mubr.f32.mxu1 %v342_v46  ;;  %v5829_v4 = vand.u32 4294901760, %v4603_v3  ;;  %3807 = vmatprep.subr.bf16.mxu1 %v3806_v62 }
  0x7f   :  { %3632 = vmatmul.mubr.f32.gmra.mrb[6].mxu0 %v5828_v27  ;;  %v5830_v9 = vand.u32 4294901760, %v4626_v54  ;;  %v5831_v20 = vand.u32 4294901760, %v4637_v50  ;;  %v381_v24 = vsub.f32 %v4695_v43, %v380_v30  ;;  %v507_v21 = vand.u32 4294901760, %v506_v33  ;;  %3903 = vmatprep.subr.bf16.mxu0 %v3902_v38 }
  0x80   :  { %3634 = vmatprep.mubr.f32.mxu0 %v5829_v4  ;;  %v400_v44 = vand.u32 4294901760, %v4741_v51  ;;  %v3810_v61 = vpack.c.bf16 %v500_v19, %v493_v41  ;;  %v514_v39 = vand.u32 4294901760, %v513_v8  ;;  %v520_v55 = vsub.f32 %v4708_v31, %v519_v34  ;;  %3467 = vmatmul.mubr.f32.gmra.mrb[8].mxu1 %v352_v22 }
  0x81   :  { %v3906_v27 = vpack.c.bf16 %v5831_v20, %v5830_v9  ;;  %v527_v46 = vsub.f32 %v4713_v59, %v526_v37  ;;  %v5832_v4 = vand.u32 4294901760, %v4643_v23  ;;  %v372_v16 = vand.u32 4294901760, %v371_v53  ;;  %3809 = vmatpush3.bf16.msra.mxu1 %v3806_v62  ;;  %3905 = vmatpush3.bf16.msra.mxu0 %v3902_v38 }
  0x82   :  { %v391_v20 = vsub.f32 %v4722_v25, %v390_v12  ;;  %v410_v9 = vand.u32 4294901760, %v4751_v7  ;;  %3469 = vmatprep.mubr.f32.mxu1 %v362_v29  ;;  %v5833_v33 = vand.u32 4294901760, %v4655_v0  ;;  %v382_v41 = vand.u32 4294901760, %v381_v24  ;;  %3811 = vmatprep.subr.bf16.mxu1 %v3810_v61 }
  0x83   :  { %3635 = vmatmul.mubr.f32.gmra.mrb[8].mxu0 %v5832_v4  ;;  %v401_v19 = vsub.f32 %v4741_v51, %v400_v44  ;;  %3907 = vmatprep.subr.bf16.mxu0 %v3906_v27  ;;  %v3814_v8 = vpack.c.bf16 %v514_v39, %v507_v21  ;;  %v5834_v22 = vand.u32 4294901760, %v4666_v32  ;;  %v521_v53 = vand.u32 4294901760, %v520_v55  ;;  %v5852_v39 = vld [vmem:[#allocation37_spill] sm:$0xff]  ;;  %v1472_v55 = vld [vmem:[#allocation11 + $0x48] sm:$0xff] }
  0x84   :  { %3637 = vmatprep.mubr.f32.mxu0 %v5833_v33  ;;  %v528_v43 = vand.u32 4294901760, %v527_v46  ;;  %3470 = vmatmul.mubr.f32.gmra.mrb[10].mxu1 %v372_v16  ;;  %v392_v25 = vand.u32 4294901760, %v391_v20  ;;  %v411_v62 = vsub.f32 %v4751_v7, %v410_v9  ;;  %v3914_v24 = vpack.c.bf16 %v526_v37, %v519_v34  ;;  %v1466_v34 = vld [vmem:[#allocation11 + $0x18] sm:$0xff]  ;;  %v1473_v46 = vld [vmem:[#allocation11 + $0x50] sm:$0xff]  ;;  %v5855_v20 = vld [vmem:[#allocation42_spill] sm:$0xff] }
  0x85   :  { %v3910_v4 = vpack.c.bf16 %v512_v28, %v5834_v22  ;;  %3813 = vmatpush3.bf16.msra.mxu1 %v3810_v61  ;;  %3909 = vmatpush3.bf16.msra.mxu0 %v3906_v27  ;;  %v402_v38 = vand.u32 4294901760, %v401_v19  ;;  %v1465_v28 = vld [vmem:[#allocation11 + $0x10] sm:$0xff]  ;;  %v5850_v27 = vld [vmem:[#allocation34_spill] sm:$0xff] }
  0x86   :  { %3472 = vmatprep.mubr.f32.mxu1 %v382_v41  ;;  %3815 = vmatprep.subr.bf16.mxu1 %v3814_v8  ;;  %v3818_v29 = vpack.c.bf16 %v528_v43, %v521_v53  ;;  %v412_v21 = vand.u32 4294901760, %v411_v62  ;;  %v4261_v43 = vmov 0   ;;  %v5848_v37 = vld [vmem:[#allocation28_spill] sm:$0xff]  ;;  %v5853_v16 = vld [vmem:[#allocation39_spill] sm:$0xff] }
  0x87   :  { %3638 = vmatmul.mubr.f32.gmra.mrb[10].mxu0 %v370_v15  ;;  %3911 = vmatprep.subr.bf16.mxu0 %v3910_v4  ;;  %v3822_v15 = vpack.c.bf16 %v4419_v36, %v4417_v35  ;;  %v3830_v35 = vpack.c.bf16 %v4491_v6, %v4486_v5  ;;  %v5835_v36 = vld [vmem:[#allocation29_spill] sm:$0xff]  ;;  %v5838_v5 = vld [vmem:[#allocation35_spill] sm:$0xff]  ;;  %v3842_v6 = vpack.c.bf16 %v4637_v50, %v4626_v54 }
  0x88   :  { %3640 = vmatprep.mubr.f32.mxu0 %v380_v30  ;;  %3473 = vmatmul.mubr.f32.gmra.mrb[12].mxu1 %v392_v25  ;;  %v3826_v25 = vpack.c.bf16 %v4450_v49, %v4448_v48  ;;  %v5836_v48 = vld [vmem:[#allocation33_spill] sm:$0xff]  ;;  %v3838_v49 = vpack.c.bf16 %v4582_v56, %v4577_v11  ;;  %v5841_v11 = vld [vmem:[#allocation27_spill] sm:$0xff]  ;;  %v5842_v56 = vld [vmem:[#allocation30_spill] sm:$0xff]  ;;  %v3850_v54 = vpack.c.bf16 %v4713_v59, %v4708_v31 }
  0x89   :  { %3817 = vmatpush3.bf16.msra.mxu1 %v3814_v8  ;;  %3913 = vmatpush3.bf16.msra.mxu0 %v3910_v4  ;;  %v5843_v50 = vld [vmem:[#allocation41_spill] sm:$0xff]  ;;  %v5846_v31 = vld [vmem:[#allocation24_spill] sm:$0xff]  ;;  %v5847_v59 = vld [vmem:[#allocation26_spill] sm:$0xff] }
  0x8a   :  { %3475 = vmatprep.mubr.f32.mxu1 %v402_v38  ;;  %3819 = vmatprep.subr.bf16.mxu1 %v3818_v29  ;;  %v1464_v30 = vld [vmem:[#allocation11 + $0x8] sm:$0xff]  ;;  %v1469_v61 = vld [vmem:[#allocation11 + $0x30] sm:$0xff] }
  0x8b   :  { %3641 = vmatmul.mubr.f32.gmra.mrb[12].mxu0 %v390_v12  ;;  %3915 = vmatprep.subr.bf16.mxu0 %v3914_v24  ;;  %v1467_v12 = vld [vmem:[#allocation11 + $0x20] sm:$0xff] }
  0x8c   :  { %3643 = vmatprep.mubr.f32.mxu0 %v400_v44  ;;  %3476 = vmatmul.mubr.f32.gmra.mrb[14].mxu1 %v412_v21  ;;  %v1463_v44 = vld [vmem:[#allocation11] sm:$0xff] }
  0x8d   :  { %3821 = vmatpush3.bf16.msra.mxu1 %v3818_v29  ;;  %3917 = vmatpush3.bf16.msra.mxu0 %v3914_v24 }
  0x8e   :  { %3510 = vmatprep.mubr.f32.mxu1 %v4378_v17  ;;  %3823 = vmatprep.subr.bf16.mxu1 %v3822_v15 }
  0x8f   :  { %3644 = vmatmul.mubr.f32.gmra.mrb[14].mxu0 %v410_v9  ;;  %3919 = vmatprep.subr.bf16.mxu0 %v4364_v10 }
  0x90   :  { %3678 = vmatprep.mubr.f32.mxu0 %v4378_v17  ;;  %3511 = vmatmul.mubr.f32.vlgmr.msra.gmra.mrb[0].mxu1 %v4400_v26 }
  0x91   :  { %3825 = vmatpush3.bf16.msra.mxu1 %v3822_v15  ;;  %3513 = vmatprep.mubr.f32.mxu1 %v4431_v42 }
  0x92   :  { %3827 = vmatprep.subr.bf16.mxu1 %v3826_v25  ;;  %4041 = vset.pattern.permute.xlu0 %v4261_v43 }
  0x93   :  { %3679 = vmatmul.mubr.f32.vlgmr.msra.gmra.mrb[0].mxu0 %v4400_v26  ;;  %4042 = vset.pattern.permute.xlu1 %v4261_v43 }
  0x94   :  { %3921 = vmatpush3.bf16.msra.mxu0 %v4364_v10  ;;  %3681 = vmatprep.mubr.f32.mxu0 %v4431_v42  ;;  %v3834_v10 = vpack.c.bf16 %v4548_v14, %v4531_v57  ;;  %v5839_v57 = vld [vmem:[#allocation38_spill] sm:$0xff]  ;;  %v3846_v14 = vpack.c.bf16 %v4675_v58, %v4666_v32  ;;  %v5844_v58 = vld [vmem:[#allocation31_spill] sm:$0xff] }
  0x95   :  { %3923 = vmatprep.subr.bf16.mxu0 %v4368_v13  ;;  %3514 = vmatmul.mubr.f32.gmra.mrb[2].mxu1 %v4446_v47  ;;  %v5845_v32 = vld [vmem:[#allocation22_spill] sm:$0xff] }
  0x96   :  { %3829 = vmatpush3.bf16.msra.mxu1 %v3826_v25  ;;  %3516 = vmatprep.mubr.f32.mxu1 %v4476_v63 }
  0x97   :  { %3682 = vmatmul.mubr.f32.gmra.mrb[2].mxu0 %v4446_v47  ;;  %3831 = vmatprep.subr.bf16.mxu1 %v3830_v35 }
  0x98   :  { %3925 = vmatpush3.bf16.msra.mxu0 %v4368_v13  ;;  %3684 = vmatprep.mubr.f32.mxu0 %v4476_v63  ;;  %v5837_v13 = vld [vmem:[#allocation23_spill] sm:$0xff] }
  0x99   :  { %3927 = vmatprep.subr.bf16.mxu0 %v4386_v18  ;;  %3517 = vmatmul.mubr.f32.gmra.mrb[4].mxu1 %v5835_v36 }
  0x9a   :  { %3833 = vmatpush3.bf16.msra.mxu1 %v3830_v35  ;;  %3519 = vmatprep.mubr.f32.mxu1 %v5836_v48 }
  0x9b   :  { %3685 = vmatmul.mubr.f32.gmra.mrb[4].mxu0 %v5835_v36  ;;  %3835 = vmatprep.subr.bf16.mxu1 %v3834_v10 }
  0x9c   :  { %3929 = vmatpush3.bf16.msra.mxu0 %v4386_v18  ;;  %3687 = vmatprep.mubr.f32.mxu0 %v5836_v48  ;;  %v5840_v18 = vld [vmem:[#allocation25_spill] sm:$0xff] }
  0x9d   :  { %3931 = vmatprep.subr.bf16.mxu0 %v5837_v13  ;;  %3520 = vmatmul.mubr.f32.gmra.mrb[6].mxu1 %v5838_v5 }
  0x9e   :  { %3837 = vmatpush3.bf16.msra.mxu1 %v3834_v10  ;;  %3522 = vmatprep.mubr.f32.mxu1 %v5839_v57 }
  0x9f   :  { %3688 = vmatmul.mubr.f32.gmra.mrb[6].mxu0 %v5838_v5  ;;  %3839 = vmatprep.subr.bf16.mxu1 %v3838_v49 }
  0xa0   :  { %3933 = vmatpush3.bf16.msra.mxu0 %v5837_v13  ;;  %3690 = vmatprep.mubr.f32.mxu0 %v5839_v57 }
  0xa1   :  { %3935 = vmatprep.subr.bf16.mxu0 %v5840_v18  ;;  %3523 = vmatmul.mubr.f32.gmra.mrb[8].mxu1 %v4605_v40 }
  0xa2   :  { %3841 = vmatpush3.bf16.msra.mxu1 %v3838_v49  ;;  %3525 = vmatprep.mubr.f32.mxu1 %v4612_v52 }
  0xa3   :  { %3691 = vmatmul.mubr.f32.gmra.mrb[8].mxu0 %v4605_v40  ;;  %3843 = vmatprep.subr.bf16.mxu1 %v3842_v6 }
  0xa4   :  { %3937 = vmatpush3.bf16.msra.mxu0 %v5840_v18  ;;  %3693 = vmatprep.mubr.f32.mxu0 %v4612_v52 }
  0xa5   :  { %3939 = vmatprep.subr.bf16.mxu0 %v5841_v11  ;;  %3526 = vmatmul.mubr.f32.gmra.mrb[10].mxu1 %v4645_v1 }
  0xa6   :  { %3845 = vmatpush3.bf16.msra.mxu1 %v3842_v6  ;;  %3528 = vmatprep.mubr.f32.mxu1 %v4661_v60 }
  0xa7   :  { %3694 = vmatmul.mubr.f32.gmra.mrb[10].mxu0 %v4645_v1  ;;  %3847 = vmatprep.subr.bf16.mxu1 %v3846_v14 }
  0xa8   :  { %3941 = vmatpush3.bf16.msra.mxu0 %v5841_v11  ;;  %3696 = vmatprep.mubr.f32.mxu0 %v4661_v60 }
  0xa9   :  { %3943 = vmatprep.subr.bf16.mxu0 %v5842_v56  ;;  %3529 = vmatmul.mubr.f32.gmra.mrb[12].mxu1 %v4686_v2 }
  0xaa   :  { %3849 = vmatpush3.bf16.msra.mxu1 %v3846_v14  ;;  %3531 = vmatprep.mubr.f32.mxu1 %v5843_v50 }
  0xab   :  { %3697 = vmatmul.mubr.f32.gmra.mrb[12].mxu0 %v4686_v2  ;;  %3851 = vmatprep.subr.bf16.mxu1 %v3850_v54 }
  0xac   :  { %3945 = vmatpush3.bf16.msra.mxu0 %v5842_v56  ;;  %3699 = vmatprep.mubr.f32.mxu0 %v5843_v50 }
  0xad   :  { %3947 = vmatprep.subr.bf16.mxu0 %v5844_v58  ;;  %3532 = vmatmul.mubr.f32.gmra.mrb[14].mxu1 %v4724_v45 }
  0xae   :  { %3853 = vmatpush3.bf16.msra.mxu1 %v3850_v54  ;;  %3566 = vmatprep.mubr.f32.mxu1 %v5845_v32 }
  0xaf   :  { %3700 = vmatmul.mubr.f32.gmra.mrb[14].mxu0 %v4724_v45  ;;  %1481 = vperm.xlu0 %4041, %v1463_v44  }
  0xb0   :  { %3949 = vmatpush3.bf16.msra.mxu0 %v5844_v58  ;;  %3734 = vmatprep.mubr.f32.mxu0 %v4378_v17  ;;  %v5849_v17 = vld [vmem:[#allocation32_spill] sm:$0xff] }
  0xb1   :  { %3567 = vmatmul.mubr.f32.vlgmr.msra.gmra.mrb[0].mxu1 %v5846_v31  ;;  %1487 = vperm.xlu1 %4042, %v1465_v28  }
  0xb2   :  { %3569 = vmatprep.mubr.f32.mxu1 %v5847_v59 }
  0xb3   :  { %3735 = vmatmul.mubr.f32.vlgmr.msra.gmra.mrb[0].mxu0 %v4400_v26  ;;  %1484 = vperm.xlu0 %4041, %v1464_v30   ;;  %v1468_v26 = vld [vmem:[#allocation11 + $0x28] sm:$0xff] }
  0xb4   :  { %3737 = vmatprep.mubr.f32.mxu0 %v4431_v42  ;;  %v5851_v42 = vld [vmem:[#allocation36_spill] sm:$0xff] }
  0xb5   :  { %3570 = vmatmul.mubr.f32.gmra.mrb[2].mxu1 %v5848_v37  ;;  %1490 = vperm.xlu1 %4042, %v1466_v34  }
  0xb6   :  { %3572 = vmatprep.mubr.f32.mxu1 %v5849_v17 }
  0xb7   :  { %3738 = vmatmul.mubr.f32.gmra.mrb[2].mxu0 %v4446_v47  ;;  %1493 = vperm.xlu0 %4041, %v1467_v12   ;;  %v1470_v47 = vld [vmem:[#allocation11 + $0x38] sm:$0xff] }
  0xb8   :  { %3740 = vmatprep.mubr.f32.mxu0 %v4476_v63  ;;  %v1471_v63 = vld [vmem:[#allocation11 + $0x40] sm:$0xff] }
  0xb9   :  { %3573 = vmatmul.mubr.f32.gmra.mrb[4].mxu1 %v5850_v27  ;;  %1496 = vperm.xlu1 %4042, %v1468_v26  }
  0xba   :  { %3575 = vmatprep.mubr.f32.mxu1 %v5851_v42 }
  0xbb   :  { %3741 = vmatmul.mubr.f32.gmra.mrb[4].mxu0 %v5835_v36  ;;  %1499 = vperm.xlu0 %4041, %v1469_v61  }
  0xbc   :  { %3743 = vmatprep.mubr.f32.mxu0 %v5836_v48 }
  0xbd   :  { %3576 = vmatmul.mubr.f32.gmra.mrb[6].mxu1 %v5852_v39  ;;  %1502 = vperm.xlu1 %4042, %v1470_v47  }
  0xbe   :  { %3578 = vmatprep.mubr.f32.mxu1 %v4603_v3  ;;  %v5854_v3 = vld [vmem:[#allocation40_spill] sm:$0xff] }
  0xbf   :  { %3744 = vmatmul.mubr.f32.gmra.mrb[6].mxu0 %v5838_v5  ;;  %1505 = vperm.xlu0 %4041, %v1471_v63  }
  0xc0   :  { %3746 = vmatprep.mubr.f32.mxu0 %v5839_v57 }
  0xc1   :  { %3579 = vmatmul.mubr.f32.gmra.mrb[8].mxu1 %v4643_v23  ;;  %1508 = vperm.xlu1 %4042, %v1472_v55   ;;  %v4876_v23 = vld [vmem:[#allocation12] ss:$0 sm:$0xff] }
  0xc2   :  { %3581 = vmatprep.mubr.f32.mxu1 %v4655_v0 }
  0xc3   :  { %3747 = vmatmul.mubr.f32.gmra.mrb[8].mxu0 %v4605_v40  ;;  %1511 = vperm.xlu0 %4041, %v1473_v46   ;;  %v1558_v40 = vlaneseq }
  0xc4   :  { %3749 = vmatprep.mubr.f32.mxu0 %v4612_v52 }
  0xc5   :  { %3582 = vmatmul.mubr.f32.gmra.mrb[10].mxu1 %v5853_v16  ;;  %v4869_v52 = vand.u32 127, %v1558_v40 }
  0xc6   :  { %3584 = vmatprep.mubr.f32.mxu1 %v5854_v3 }
  0xc7   :  { %3750 = vmatmul.mubr.f32.gmra.mrb[10].mxu0 %v4645_v1  ;;  %v4871_v1 = vshrl.u32 %v1558_v40, 7  ;;  %vm1612_vm0 = vcmp.lt.s32.totalorder %v4869_v52, 8 }
  0xc8   :  { %3752 = vmatprep.mubr.f32.mxu0 %v4661_v60 }
  0xc9   :  { %3585 = vmatmul.mubr.f32.gmra.mrb[12].mxu1 %v5855_v20  ;;  %vm1596_vm1 = vcmp.ne.s32.totalorder %v4871_v1, %v4869_v52  ;;  %v1561_v33 = vadd.s32 16, %v4871_v1  ;;  %v1562_v19 = vadd.s32 24, %v4871_v1  ;;  %v1564_v6 = vadd.s32 40, %v4871_v1 }
  0xca   :  { %3587 = vmatprep.mubr.f32.mxu1 %v4741_v51  ;;  %vm4880_vm2 = vmand %vm1596_vm1, %vm1612_vm0  ;;  %v4263_v51 = vmov -inf   ;;  %v1563_v14 = vadd.s32 32, %v4871_v1  ;;  %v1565_v55 = vadd.s32 48, %v4871_v1  ;;  %v1566_v3 = vadd.s32 56, %v4871_v1 }
  0xcb   :  { %3753 = vmatmul.mubr.f32.gmra.mrb[12].mxu0 %v4686_v2  ;;  %v5760_v2 = vmov 0.0   ;;  %82 = vst.msk [vmem:[#allocation2 + $0x8] sm:$0xff] %vm80_vm5, %v4263_v51  ;;  %81 = vst.msk [vmem:[#allocation2] sm:$0xff] %vm80_vm5, %v4263_v51  ;;  %vm1598_vm9 = vcmp.ne.s32.totalorder %v1561_v33, %v4869_v52  ;;  %vm1599_vm11 = vcmp.ne.s32.totalorder %v1562_v19, %v4869_v52  ;;  %v1572_v39 = vadd.s32 104, %v4871_v1 }
  0xcc   :  { %3755 = vmatprep.mubr.f32.mxu0 %v5843_v50  ;;  %129 = vst.msk [vmem:[#allocation5] sm:$0xff] %vm80_vm5, %v5760_v2  ;;  %97 = vst.msk [vmem:[#allocation3] sm:$0xff] %vm80_vm5, %v5760_v2 }
  0xcd   :  { %3588 = vmatmul.mubr.f32.gmra.mrb[14].mxu1 %v4751_v7  ;;  %98 = vst.msk [vmem:[#allocation3 + $0x8] sm:$0xff] %vm80_vm5, %v5760_v2  ;;  %99 = vst.msk [vmem:[#allocation3 + $0x10] sm:$0xff] %vm80_vm5, %v5760_v2  ;;  %v1560_v7 = vadd.s32 8, %v4871_v1 }
  0xce   :  { %100 = vst.msk [vmem:[#allocation3 + $0x18] sm:$0xff] %vm80_vm5, %v5760_v2  ;;  %101 = vst.msk [vmem:[#allocation3 + $0x20] sm:$0xff] %vm80_vm5, %v5760_v2 }
  0xcf   :  { %3756 = vmatmul.mubr.f32.gmra.mrb[14].mxu0 %v4724_v45  ;;  %102 = vst.msk [vmem:[#allocation3 + $0x28] sm:$0xff] %vm80_vm5, %v5760_v2  ;;  %103 = vst.msk [vmem:[#allocation3 + $0x30] sm:$0xff] %vm80_vm5, %v5760_v2  ;;  %vm1597_vm6 = vcmp.ne.s32.totalorder %v1560_v7, %v4869_v52 }
  0xd0   :  { %104 = vst.msk [vmem:[#allocation3 + $0x38] sm:$0xff] %vm80_vm5, %v5760_v2  ;;  %105 = vst.msk [vmem:[#allocation3 + $0x40] sm:$0xff] %vm80_vm5, %v5760_v2 }
  0xd1   :  { %106 = vst.msk [vmem:[#allocation3 + $0x48] sm:$0xff] %vm80_vm5, %v5760_v2  ;;  %107 = vst.msk [vmem:[#allocation3 + $0x50] sm:$0xff] %vm80_vm5, %v5760_v2 }
  0xd2   :  { %108 = vst.msk [vmem:[#allocation3 + $0x58] sm:$0xff] %vm80_vm5, %v5760_v2  ;;  %109 = vst.msk [vmem:[#allocation3 + $0x60] sm:$0xff] %vm80_vm5, %v5760_v2 }
  0xd3   :  { %110 = vst.msk [vmem:[#allocation3 + $0x68] sm:$0xff] %vm80_vm5, %v5760_v2  ;;  %111 = vst.msk [vmem:[#allocation3 + $0x70] sm:$0xff] %vm80_vm5, %v5760_v2 }
  0xd4   :  { %112 = vst.msk [vmem:[#allocation3 + $0x78] sm:$0xff] %vm80_vm5, %v5760_v2  ;;  %113 = vst.msk [vmem:[#allocation4] sm:$0xff] %vm80_vm5, %v5760_v2 }
  0xd5   :  { %114 = vst.msk [vmem:[#allocation4 + $0x8] sm:$0xff] %vm80_vm5, %v5760_v2  ;;  %115 = vst.msk [vmem:[#allocation4 + $0x10] sm:$0xff] %vm80_vm5, %v5760_v2 }
  0xd6   :  { %116 = vst.msk [vmem:[#allocation4 + $0x18] sm:$0xff] %vm80_vm5, %v5760_v2  ;;  %117 = vst.msk [vmem:[#allocation4 + $0x20] sm:$0xff] %vm80_vm5, %v5760_v2 }
  0xd7   :  { %118 = vst.msk [vmem:[#allocation4 + $0x28] sm:$0xff] %vm80_vm5, %v5760_v2  ;;  %119 = vst.msk [vmem:[#allocation4 + $0x30] sm:$0xff] %vm80_vm5, %v5760_v2 }
  0xd8   :  { %120 = vst.msk [vmem:[#allocation4 + $0x38] sm:$0xff] %vm80_vm5, %v5760_v2  ;;  %121 = vst.msk [vmem:[#allocation4 + $0x40] sm:$0xff] %vm80_vm5, %v5760_v2 }
  0xd9   :  { %122 = vst.msk [vmem:[#allocation4 + $0x48] sm:$0xff] %vm80_vm5, %v5760_v2  ;;  %123 = vst.msk [vmem:[#allocation4 + $0x50] sm:$0xff] %vm80_vm5, %v5760_v2 }
  0xda   :  { %124 = vst.msk [vmem:[#allocation4 + $0x58] sm:$0xff] %vm80_vm5, %v5760_v2  ;;  %125 = vst.msk [vmem:[#allocation4 + $0x60] sm:$0xff] %vm80_vm5, %v5760_v2 }
  0xdb   :  { %126 = vst.msk [vmem:[#allocation4 + $0x68] sm:$0xff] %vm80_vm5, %v5760_v2  ;;  %127 = vst.msk [vmem:[#allocation4 + $0x70] sm:$0xff] %vm80_vm5, %v5760_v2 }
  0xdc   :  { %128 = vst.msk [vmem:[#allocation4 + $0x78] sm:$0xff] %vm80_vm5, %v5760_v2  ;;  %130 = vst.msk [vmem:[#allocation5 + $0x8] sm:$0xff] %vm80_vm5, %v5760_v2 }
  0xdd   :  { %131 = vst.msk [vmem:[#allocation5 + $0x10] sm:$0xff] %vm80_vm5, %v5760_v2  ;;  %132 = vst.msk [vmem:[#allocation5 + $0x18] sm:$0xff] %vm80_vm5, %v5760_v2 }
  0xde   :  { %133 = vst.msk [vmem:[#allocation5 + $0x20] sm:$0xff] %vm80_vm5, %v5760_v2  ;;  %134 = vst.msk [vmem:[#allocation5 + $0x28] sm:$0xff] %vm80_vm5, %v5760_v2 }
  0xdf   :  { %135 = vst.msk [vmem:[#allocation5 + $0x30] sm:$0xff] %vm80_vm5, %v5760_v2  ;;  %136 = vst.msk [vmem:[#allocation5 + $0x38] sm:$0xff] %vm80_vm5, %v5760_v2 }
  0xe0   :  { %137 = vst.msk [vmem:[#allocation5 + $0x40] sm:$0xff] %vm80_vm5, %v5760_v2  ;;  %138 = vst.msk [vmem:[#allocation5 + $0x48] sm:$0xff] %vm80_vm5, %v5760_v2 }
  0xe1   :  { %139 = vst.msk [vmem:[#allocation5 + $0x50] sm:$0xff] %vm80_vm5, %v5760_v2  ;;  %140 = vst.msk [vmem:[#allocation5 + $0x58] sm:$0xff] %vm80_vm5, %v5760_v2 }
  0xe2   :  { %141 = vst.msk [vmem:[#allocation5 + $0x60] sm:$0xff] %vm80_vm5, %v5760_v2  ;;  %142 = vst.msk [vmem:[#allocation5 + $0x68] sm:$0xff] %vm80_vm5, %v5760_v2 }
  0xe3   :  { %143 = vst.msk [vmem:[#allocation5 + $0x70] sm:$0xff] %vm80_vm5, %v5760_v2  ;;  %144 = vst.msk [vmem:[#allocation5 + $0x78] sm:$0xff] %vm80_vm5, %v5760_v2 }
  0xe4   :  { %3131 = vst.msk [vmem:[#allocation14 + $0x8] sm:$0xff] %vm80_vm5, %v5760_v2  ;;  %3132 = vst.msk [vmem:[#allocation14 + $0x10] sm:$0xff] %vm80_vm5, %v5760_v2 }
  0xe5   :  { %3133 = vst.msk [vmem:[#allocation14 + $0x18] sm:$0xff] %vm80_vm5, %v5760_v2  ;;  %3134 = vst.msk [vmem:[#allocation14 + $0x20] sm:$0xff] %vm80_vm5, %v5760_v2 }
  0xe6   :  { %3135 = vst.msk [vmem:[#allocation14 + $0x28] sm:$0xff] %vm80_vm5, %v5760_v2  ;;  %3136 = vst.msk [vmem:[#allocation14 + $0x30] sm:$0xff] %vm80_vm5, %v5760_v2 }
  0xe7   :  { %3137 = vst.msk [vmem:[#allocation14 + $0x38] sm:$0xff] %vm80_vm5, %v5760_v2  ;;  %3138 = vst.msk [vmem:[#allocation14 + $0x40] sm:$0xff] %vm80_vm5, %v5760_v2 }
  0xe8   :  { %3139 = vst.msk [vmem:[#allocation14 + $0x48] sm:$0xff] %vm80_vm5, %v5760_v2  ;;  %3140 = vst.msk [vmem:[#allocation14 + $0x50] sm:$0xff] %vm80_vm5, %v5760_v2 }
  0xe9   :  { %3141 = vst.msk [vmem:[#allocation14 + $0x58] sm:$0xff] %vm80_vm5, %v5760_v2  ;;  %3142 = vst.msk [vmem:[#allocation14 + $0x60] sm:$0xff] %vm80_vm5, %v5760_v2 }
  0xea   :  { %3143 = vst.msk [vmem:[#allocation14 + $0x68] sm:$0xff] %vm80_vm5, %v5760_v2  ;;  %3144 = vst.msk [vmem:[#allocation14 + $0x70] sm:$0xff] %vm80_vm5, %v5760_v2 }
  0xeb   :  { %3145 = vst.msk [vmem:[#allocation14 + $0x78] sm:$0xff] %vm80_vm5, %v5760_v2  ;;  %3147 = vst.msk [vmem:[#allocation15 + $0x8] sm:$0xff] %vm80_vm5, %v5760_v2 }
  0xec   :  { %3148 = vst.msk [vmem:[#allocation15 + $0x10] sm:$0xff] %vm80_vm5, %v5760_v2  ;;  %3149 = vst.msk [vmem:[#allocation15 + $0x18] sm:$0xff] %vm80_vm5, %v5760_v2 }
  0xed   :  { %3150 = vst.msk [vmem:[#allocation15 + $0x20] sm:$0xff] %vm80_vm5, %v5760_v2  ;;  %3151 = vst.msk [vmem:[#allocation15 + $0x28] sm:$0xff] %vm80_vm5, %v5760_v2 }
  0xee   :  { %3152 = vst.msk [vmem:[#allocation15 + $0x30] sm:$0xff] %vm80_vm5, %v5760_v2  ;;  %3153 = vst.msk [vmem:[#allocation15 + $0x38] sm:$0xff] %vm80_vm5, %v5760_v2 }
  0xef   :  { %3154 = vst.msk [vmem:[#allocation15 + $0x40] sm:$0xff] %vm80_vm5, %v5760_v2  ;;  %3155 = vst.msk [vmem:[#allocation15 + $0x48] sm:$0xff] %vm80_vm5, %v5760_v2 }
  0xf0   :  { %3156 = vst.msk [vmem:[#allocation15 + $0x50] sm:$0xff] %vm80_vm5, %v5760_v2  ;;  %3157 = vst.msk [vmem:[#allocation15 + $0x58] sm:$0xff] %vm80_vm5, %v5760_v2 }
  0xf1   :  { %3158 = vst.msk [vmem:[#allocation15 + $0x60] sm:$0xff] %vm80_vm5, %v5760_v2  ;;  %3159 = vst.msk [vmem:[#allocation15 + $0x68] sm:$0xff] %vm80_vm5, %v5760_v2 }
  0xf2   :  { %3160 = vst.msk [vmem:[#allocation15 + $0x70] sm:$0xff] %vm80_vm5, %v5760_v2  ;;  %3161 = vst.msk [vmem:[#allocation15 + $0x78] sm:$0xff] %vm80_vm5, %v5760_v2 }
  0xf3   :  { %83 = vst.msk [vmem:[#allocation2 + $0x10] sm:$0xff] %vm80_vm5, %v4263_v51  ;;  %84 = vst.msk [vmem:[#allocation2 + $0x18] sm:$0xff] %vm80_vm5, %v4263_v51 }
  0xf4   :  { %85 = vst.msk [vmem:[#allocation2 + $0x20] sm:$0xff] %vm80_vm5, %v4263_v51  ;;  %86 = vst.msk [vmem:[#allocation2 + $0x28] sm:$0xff] %vm80_vm5, %v4263_v51 }
  0xf5   :  { %87 = vst.msk [vmem:[#allocation2 + $0x30] sm:$0xff] %vm80_vm5, %v4263_v51  ;;  %88 = vst.msk [vmem:[#allocation2 + $0x38] sm:$0xff] %vm80_vm5, %v4263_v51 }
  0xf6   :  { %89 = vst.msk [vmem:[#allocation2 + $0x40] sm:$0xff] %vm80_vm5, %v4263_v51  ;;  %90 = vst.msk [vmem:[#allocation2 + $0x48] sm:$0xff] %vm80_vm5, %v4263_v51 }
  0xf7   :  { %91 = vst.msk [vmem:[#allocation2 + $0x50] sm:$0xff] %vm80_vm5, %v4263_v51  ;;  %92 = vst.msk [vmem:[#allocation2 + $0x58] sm:$0xff] %vm80_vm5, %v4263_v51 }
  0xf8   :  { %93 = vst.msk [vmem:[#allocation2 + $0x60] sm:$0xff] %vm80_vm5, %v4263_v51  ;;  %94 = vst.msk [vmem:[#allocation2 + $0x68] sm:$0xff] %vm80_vm5, %v4263_v51 }
  0xf9   :  { %95 = vst.msk [vmem:[#allocation2 + $0x70] sm:$0xff] %vm80_vm5, %v4263_v51  ;;  %96 = vst.msk [vmem:[#allocation2 + $0x78] sm:$0xff] %vm80_vm5, %v4263_v51 }
  0xfa   :  { %vm1616_vm7 = vmand %vm1597_vm6, %vm1612_vm0 }
  0xfb   :  { %vm5085_vm12 = vmand %vm1598_vm9, %vm1612_vm0 }
  0xfc   :  { %vm5093_vm14 = vmand %vm1599_vm11, %vm1612_vm0 }
 0x12e   :  { %v1482_v0 = vpop.permute.xlu0 %1481 }
 0x12f   :  { %vm1532_vm3 = vcmp.eq.s32.totalorder %v1482_v0, %v4876_v23 }
 0x130   :  { %vm1647_vm4 = vmand %vm4880_vm2, %vm1532_vm3  ;;  %v1488_v9 = vpop.permute.xlu1 %1487  ;;  %vm1601_vm3 = vcmp.ne.s32.totalorder %v1564_v6, %v4869_v52 }
 0x131   :  { %v4888_v45 = vsel %vm1647_vm4, 1.0, %v5760_v2  ;;  %vm1534_vm13 = vcmp.eq.s32.totalorder %v1488_v9, %v4876_v23  ;;  %vm1600_vm4 = vcmp.ne.s32.totalorder %v1563_v14, %v4869_v52  ;;  %vm5135_vm6 = vmand %vm1601_vm3, %vm1612_vm0 }
 0x132   :  { %2160 = vadd.xlane.f32.xlu1 %v4888_v45  ;;  %v1485_v41 = vpop.permute.xlu0 %1484  ;;  %vm1649_vm1 = vmand %vm5085_vm12, %vm1534_vm13  ;;  %vm1603_vm13 = vcmp.ne.s32.totalorder %v1566_v3, %v4869_v52 }
 0x133   :  { %vm1533_vm8 = vcmp.eq.s32.totalorder %v1485_v41, %v4876_v23  ;;  %v5117_v31 = vsel %vm1649_vm1, 1.0, %v5760_v2  ;;  %vm1622_vm1 = vmand %vm1603_vm13, %vm1612_vm0 }
 0x134   :  { %vm5071_vm10 = vmand %vm1616_vm7, %vm1533_vm8  ;;  %v1491_v24 = vpop.permute.xlu1 %1490 }
 0x135   :  { %vm1535_vm15 = vcmp.eq.s32.totalorder %v1491_v24, %v4876_v23  ;;  %v5102_v18 = vsel %vm5071_vm10, 1.0, %v5760_v2  ;;  %vm5147_vm8 = vmand %vm1600_vm4, %vm1612_vm0 }
 0x136   :  { %v1494_v27 = vpop.permute.xlu0 %1493 }
 0x137   :  { %vm1536_vm9 = vcmp.eq.s32.totalorder %v1494_v27, %v4876_v23  ;;  %v1570_v27 = vadd.s32 88, %v4871_v1 }
 0x138   :  { %v1497_v44 = vpop.permute.xlu1 %1496  ;;  %vm1651_vm11 = vmand %vm5147_vm8, %vm1536_vm9 }
 0x184   :  { %v3568_v8 = vpop.f32.mrb[0].mxu1 }
 0x185   :  { %v759_v53 = vpop.f32.mrb[1].mxu1 }
 0x186   :  { %v3736_v22 = vpop.f32.mrb[0].mxu0 }
 0x187   :  { %v3950_v4 = vadd.f32 %v3736_v22, %v3568_v8  ;;  %v1369_v62 = vpop.f32.mrb[1].mxu0 }
 0x188   :  { %v3951_v38 = vadd.f32 %v1369_v62, %v759_v53  ;;  %v3571_v25 = vpop.f32.mrb[2].mxu1  ;;  %v1500_v53 = vpop.permute.xlu0 %1499 }
 0x189   :  { %v5076_v21 = vsel %vm1616_vm7, %v3950_v4, -inf  ;;  %v773_v13 = vpop.f32.mrb[3].mxu1  ;;  %v2065_v11 = vmul.f32 %v3950_v4, %v5102_v18  ;;  %vm1537_vm7 = vcmp.eq.s32.totalorder %v1497_v44, %v4876_v23  ;;  %v5181_v4 = vsel %vm1651_vm11, 1.0, %v5760_v2 }
 0x18a   :  { %v3739_v15 = vpop.f32.mrb[2].mxu0  ;;  %1697 = vmax.xlane.f32.xlu0 %v5076_v21  ;;  %v5081_v35 = vsel %vm4880_vm2, %v3951_v38, -inf  ;;  %v2064_v57 = vmul.f32 %v3951_v38, %v4888_v45  ;;  %vm1650_vm2 = vmand %vm5093_vm14, %vm1535_vm15  ;;  %v1503_v45 = vpop.permute.xlu1 %1502  ;;  %vm1538_vm15 = vcmp.eq.s32.totalorder %v1500_v53, %v4876_v23 }
 0x18b   :  { %v3952_v36 = vadd.f32 %v3739_v15, %v3571_v25  ;;  %v1381_v48 = vpop.f32.mrb[3].mxu0  ;;  %1695 = vmax.xlane.f32.xlu1 %v5081_v35  ;;  %v5126_v37 = vsel %vm1650_vm2, 1.0, %v5760_v2  ;;  %vm1652_vm10 = vmand %vm5135_vm6, %vm1537_vm7  ;;  %v1567_v15 = vadd.s32 64, %v4871_v1  ;;  %vm1539_vm2 = vcmp.eq.s32.totalorder %v1503_v45, %v4876_v23 }
 0x18c   :  { %v3953_v5 = vadd.f32 %v1381_v48, %v773_v13  ;;  %v3574_v54 = vpop.f32.mrb[4].mxu1  ;;  %v5174_v41 = vsel %vm1652_vm10, 1.0, %v5760_v2  ;;  %vm5207_vm4 = vmand %vm1622_vm1, %vm1539_vm2  ;;  %v1506_v44 = vpop.permute.xlu0 %1505  ;;  %vm1609_vm2 = vcmp.ne.s32.totalorder %v1572_v39, %v4869_v52  ;;  %v2048_v39 = vld [vmem:[#allocation4] sm:$0xff] }
 0x18d   :  { %v787_v32 = vpop.f32.mrb[5].mxu1  ;;  %v5114_v28 = vsel %vm5093_vm14, %v3952_v36, -inf  ;;  %v2067_v63 = vmul.f32 %v3952_v36, %v5126_v37  ;;  %v1568_v36 = vadd.s32 72, %v4871_v1  ;;  %vm1540_vm9 = vcmp.eq.s32.totalorder %v1506_v44, %v4876_v23  ;;  %v5367_v44 = vld [vmem:[#allocation2] sm:$0xff] }
 0x18e   :  { %v3742_v56 = vpop.f32.mrb[4].mxu0  ;;  %2080 = vadd.xlane.f32.xlu0 %v2064_v57  ;;  %v5123_v34 = vsel %vm5085_vm12, %v3953_v5, -inf  ;;  %v2066_v47 = vmul.f32 %v3953_v5, %v5117_v31  ;;  %vm1602_vm12 = vcmp.ne.s32.totalorder %v1565_v55, %v4869_v52  ;;  %v1509_v6 = vpop.permute.xlu1 %1508 }
 0x18f   :  { %v3954_v50 = vadd.f32 %v3742_v56, %v3574_v54  ;;  %v1393_v58 = vpop.f32.mrb[5].mxu0  ;;  %2082 = vadd.xlane.f32.xlu1 %v2065_v11  ;;  %vm5190_vm14 = vmand %vm1602_vm12, %vm1612_vm0  ;;  %vm1605_vm7 = vcmp.ne.s32.totalorder %v1568_v36, %v4869_v52  ;;  %vm1541_vm11 = vcmp.eq.s32.totalorder %v1509_v6, %v4876_v23  ;;  %v1474_v6 = vld [vmem:[#allocation11 + $0x58] sm:$0xff] }
 0x190   :  { %v3955_v43 = vadd.f32 %v1393_v58, %v787_v32  ;;  %v3577_v30 = vpop.f32.mrb[6].mxu1  ;;  %vm1653_vm3 = vmand %vm5190_vm14, %vm1538_vm15  ;;  %v1512_v45 = vpop.permute.xlu0 %1511 }
 0x191   :  { %v801_v26 = vpop.f32.mrb[7].mxu1  ;;  %v5165_v51 = vsel %vm5135_vm6, %v3954_v50, -inf  ;;  %v2069_v24 = vmul.f32 %v3954_v50, %v5174_v41  ;;  %vm1604_vm6 = vcmp.ne.s32.totalorder %v1567_v15, %v4869_v52  ;;  %vm1624_vm10 = vmand %vm1605_vm7, %vm1612_vm0 }
 0x192   :  { %v3745_v59 = vpop.f32.mrb[6].mxu0  ;;  %1701 = vmax.xlane.f32.xlu0 %v5114_v28  ;;  %v5171_v33 = vsel %vm5147_vm8, %v3955_v43, -inf  ;;  %v2068_v38 = vmul.f32 %v3955_v43, %v5181_v4  ;;  %v5226_v43 = vsel %vm1653_vm3, 1.0, %v5760_v2  ;;  %vm1623_vm8 = vmand %vm1604_vm6, %vm1612_vm0 }
 0x193   :  { %v5128_v17 = vadd.f32 %v3745_v59, %v3577_v30  ;;  %v1405_v12 = vpop.f32.mrb[7].mxu0  ;;  %1699 = vmax.xlane.f32.xlu1 %v5123_v34  ;;  %vm1655_vm12 = vmand %vm1623_vm8, %vm1540_vm9 }
 0x194   :  { %v5140_v61 = vadd.f32 %v1405_v12, %v801_v26  ;;  %v3580_v16 = vpop.f32.mrb[8].mxu1  ;;  %v5235_v12 = vsel %vm5207_vm4, 1.0, %v5760_v2  ;;  %vm1656_vm13 = vmand %vm1624_vm10, %vm1541_vm11 }
 0x195   :  { %v815_v0 = vpop.f32.mrb[9].mxu1  ;;  %v5212_v11 = vsel %vm1622_vm1, %v5128_v17, -inf  ;;  %v2071_v26 = vmul.f32 %v5128_v17, %v5235_v12  ;;  %v5265_v55 = vsel %vm1656_vm13, 1.0, %v5760_v2  ;;  %vm5300_vm6 = vmand %vm1609_vm2, %vm1612_vm0 }
 0x196   :  { %v3748_v46 = vpop.f32.mrb[8].mxu0  ;;  %2084 = vadd.xlane.f32.xlu0 %v2066_v47  ;;  %v5219_v54 = vsel %vm5190_vm14, %v5140_v61, -inf  ;;  %v2070_v30 = vmul.f32 %v5140_v61, %v5226_v43  ;;  %v1569_v61 = vadd.s32 80, %v4871_v1  ;;  %v5258_v47 = vsel %vm1655_vm12, 1.0, %v5760_v2 }
 0x197   :  { %v5157_v20 = vadd.f32 %v3748_v46, %v3580_v16  ;;  %v1417_v40 = vpop.f32.mrb[9].mxu0  ;;  %2086 = vadd.xlane.f32.xlu1 %v2067_v63  ;;  %vm1607_vm14 = vcmp.ne.s32.totalorder %v1570_v27, %v4869_v52  ;;  %v1571_v46 = vadd.s32 96, %v4871_v1 }
 0x198   :  { %v5161_v60 = vadd.f32 %v1417_v40, %v815_v0  ;;  %v3583_v9 = vpop.f32.mrb[10].mxu1  ;;  %vm1606_vm15 = vcmp.ne.s32.totalorder %v1569_v61, %v4869_v52  ;;  %vm5273_vm1 = vmand %vm1607_vm14, %vm1612_vm0  ;;  %v1574_v40 = vadd.s32 120, %v4871_v1  ;;  %v1573_v0 = vadd.s32 112, %v4871_v1 }
 0x199   :  { %v829_v22 = vpop.f32.mrb[11].mxu1  ;;  %v5249_v42 = vsel %vm1624_vm10, %v5157_v20, -inf  ;;  %v2073_v16 = vmul.f32 %v5157_v20, %v5265_v55  ;;  %vm1608_vm3 = vcmp.ne.s32.totalorder %v1571_v46, %v4869_v52  ;;  %vm5283_vm4 = vmand %vm1606_vm15, %vm1612_vm0  ;;  %vm1542_vm10 = vcmp.eq.s32.totalorder %v1512_v45, %v4876_v23  ;;  %v2049_v46 = vld [vmem:[#allocation4 + $0x8] sm:$0xff] }
 0x19a   :  { %v3751_v7 = vpop.f32.mrb[10].mxu0  ;;  %1705 = vmax.xlane.f32.xlu0 %v5165_v51  ;;  %v5254_v17 = vsel %vm1623_vm8, %v5161_v60, -inf  ;;  %v2072_v63 = vmul.f32 %v5161_v60, %v5258_v47  ;;  %vm5307_vm7 = vmand %vm1608_vm3, %vm1612_vm0  ;;  %vm1611_vm8 = vcmp.ne.s32.totalorder %v1574_v40, %v4869_v52  ;;  %vm1610_vm9 = vcmp.ne.s32.totalorder %v1573_v0, %v4869_v52 }
 0x19b   :  { %v5177_v19 = vadd.f32 %v3751_v7, %v3583_v9  ;;  %v1429_v8 = vpop.f32.mrb[11].mxu0  ;;  %1703 = vmax.xlane.f32.xlu1 %v5171_v33  ;;  %vm5327_vm11 = vmand %vm1611_vm8, %vm1612_vm0 }
 0x19c   :  { %v5183_v62 = vadd.f32 %v1429_v8, %v829_v22  ;;  %v3586_v10 = vpop.f32.mrb[12].mxu1  ;;  %vm5334_vm12 = vmand %vm1610_vm9, %vm1612_vm0 }
 0x19d   :  { %v843_v49 = vpop.f32.mrb[13].mxu1  ;;  %v5290_v60 = vsel %vm5273_vm1, %v5177_v19, -inf  ;;  %vm1657_vm13 = vmand %vm5283_vm4, %vm1542_vm10 }
 0x19e   :  { %v3754_v25 = vpop.f32.mrb[12].mxu0  ;;  %2088 = vadd.xlane.f32.xlu0 %v2068_v38  ;;  %v5296_v7 = vsel %vm5283_vm4, %v5183_v62, -inf  ;;  %v5353_v52 = vsel %vm1657_vm13, 1.0, %v5760_v2  ;;  %v2054_v2 = vld [vmem:[#allocation4 + $0x30] sm:$0xff] }
 0x19f   :  { %v5201_v48 = vadd.f32 %v3754_v25, %v3586_v10  ;;  %v1441_v13 = vpop.f32.mrb[13].mxu0  ;;  %2090 = vadd.xlane.f32.xlu1 %v2069_v24  ;;  %v2074_v15 = vmul.f32 %v5183_v62, %v5353_v52  ;;  %v2144_v25 = vld [vmem:[#allocation5] sm:$0xff] }
 0x1a0   :  { %v5205_v5 = vadd.f32 %v1441_v13, %v843_v49  ;;  %v3589_v56 = vpop.f32.mrb[14].mxu1  ;;  %v1476_v13 = vld [vmem:[#allocation11 + $0x68] sm:$0xff]  ;;  %v1478_v49 = vld [vmem:[#allocation11 + $0x78] sm:$0xff]  ;;  %v1475_v62 = vld [vmem:[#allocation11 + $0x60] sm:$0xff] }
 0x1a1   :  { %v857_v32 = vpop.f32.mrb[15].mxu1  ;;  %v5317_v8 = vsel %vm5300_vm6, %v5201_v48, -inf }
 0x1a2   :  { %v3757_v14 = vpop.f32.mrb[14].mxu0  ;;  %1709 = vmax.xlane.f32.xlu0 %v5212_v11  ;;  %v5323_v22 = vsel %vm5307_vm7, %v5205_v5, -inf }
 0x1a3   :  { %v5222_v50 = vadd.f32 %v3757_v14, %v3589_v56  ;;  %v1453_v58 = vpop.f32.mrb[15].mxu0  ;;  %1707 = vmax.xlane.f32.xlu1 %v5219_v54  ;;  %v1477_v56 = vld [vmem:[#allocation11 + $0x70] sm:$0xff] }
 0x1a4   :  { %v5228_v59 = vadd.f32 %v1453_v58, %v857_v32  ;;  %v5365_v32 = vld [vmem:[#allocation2 + $0x8] sm:$0xff] }
 0x1a5   :  { %v5343_v29 = vsel %vm5327_vm11, %v5222_v50, -inf }
 0x1a6   :  { %2092 = vadd.xlane.f32.xlu0 %v2070_v30  ;;  %v5349_v24 = vsel %vm5334_vm12, %v5228_v59, -inf }
 0x1a7   :  { %2094 = vadd.xlane.f32.xlu1 %v2071_v26 }
 0x1aa   :  { %1713 = vmax.xlane.f32.xlu0 %v5249_v42 }
 0x1ab   :  { %1711 = vmax.xlane.f32.xlu1 %v5254_v17 }
 0x1ae   :  { %2096 = vadd.xlane.f32.xlu0 %v2072_v63 }
 0x1af   :  { %2098 = vadd.xlane.f32.xlu1 %v2073_v16 }
 0x1b2   :  { %1717 = vmax.xlane.f32.xlu0 %v5290_v60 }
 0x1b3   :  { %1715 = vmax.xlane.f32.xlu1 %v5296_v7 }
 0x1b6   :  { %1721 = vmax.xlane.f32.xlu0 %v5317_v8 }
 0x1b7   :  { %1719 = vmax.xlane.f32.xlu1 %v5323_v22 }
 0x1ba   :  { %1725 = vmax.xlane.f32.xlu0 %v5343_v29 }
 0x1bb   :  { %1723 = vmax.xlane.f32.xlu1 %v5349_v24 }
 0x1be   :  { %2100 = vadd.xlane.f32.xlu0 %v2074_v15  ;;  %v5385_v15 = vld [vmem:[#allocation2 + $0x18] sm:$0xff] }
 0x1bf   :  { %v2161_v10 = vpop.xlane.xlu1 %2160 }
 0x1c0   :  { %v2192_v36 = vadd.f32 %v2161_v10, %v2144_v25  ;;  %v5388_v25 = vld [vmem:[#allocation2 + $0x10] sm:$0xff] }
 0x1c2   :  { %2208 = vst.msk [vmem:[#allocation5] sm:$0xff] %vm80_vm5, %v2192_v36 }
 0x1c9   :  { %v5358_v57 = vld [vmem:[#allocation5] sm:$0xff] }
 0x1ca   :  { %5884 = vst [vmem:[#allocation29_spill] sm:$0xff] %v5358_v57  ;;  %v5361_v14 = vadd.f32 1.0, %v5358_v57 }
 0x1cc   :  { %1520 = vperm.xlu1 %4042, %v1476_v13   ;;  %5885 = vst [vmem:[#allocation33_spill] sm:$0xff] %v5361_v14  ;;  %4043 = vrcp.f32 %v5361_v14 }
 0x1d0   :  { %1526 = vperm.xlu1 %4042, %v1478_v49  }
 0x1d4   :  { %1514 = vperm.xlu0 %4041, %v1474_v6   ;;  %v2050_v6 = vld [vmem:[#allocation4 + $0x10] sm:$0xff] }
 0x1d6   :  { %v4044_v58 = vpop.eup %4043 }
 0x1d7   :  { %3146 = vst.msk [vmem:[#allocation15] sm:$0xff] %vm80_vm5, %v4044_v58 }
 0x1d8   :  { %1517 = vperm.xlu0 %4041, %v1475_v62   ;;  %v5429_v62 = vld [vmem:[#allocation2 + $0x38] sm:$0xff] }
 0x1d9   :  { %5886 = vst [vmem:[#allocation23_spill] sm:$0xff] %v5429_v62 }
 0x1dc   :  { %1523 = vperm.xlu0 %4041, %v1477_v56   ;;  %v2051_v56 = vld [vmem:[#allocation4 + $0x18] sm:$0xff] }
 0x217   :  { %v1698_v30 = vpop.xlane.xlu0 %1697 }
 0x218   :  { %v5370_v26 = vmax.f32 %v5365_v32, %v1698_v30  ;;  %v1696_v27 = vpop.xlane.xlu1 %1695 }
 0x219   :  { %v5373_v61 = vmax.f32 %v5367_v44, %v1696_v27 }
 0x21a   :  { %2033 = vst.msk [vmem:[#allocation2 + $0x8] sm:$0xff] %vm80_vm5, %v5370_v26  ;;  %1814 = vperm.xlu0 %4041, %v5370_v26  }
 0x21b   :  { %2032 = vst.msk [vmem:[#allocation2] sm:$0xff] %vm80_vm5, %v5373_v61  ;;  %v2081_v40 = vpop.xlane.xlu0 %2080  ;;  %1809 = vperm.xlu1 %4042, %v5373_v61  }
 0x21c   :  { %v2112_v0 = vadd.f32 %v2081_v40, %v2048_v39  ;;  %v2083_v20 = vpop.xlane.xlu1 %2082  ;;  %v5406_v40 = vld [vmem:[#allocation2 + $0x28] sm:$0xff] }
 0x21d   :  { %v2113_v45 = vadd.f32 %v2083_v20, %v2049_v46 }
 0x21e   :  { %2128 = vst.msk [vmem:[#allocation4] sm:$0xff] %vm80_vm5, %v2112_v0  ;;  %v5410_v0 = vld [vmem:[#allocation2 + $0x20] sm:$0xff] }
 0x21f   :  { %2129 = vst.msk [vmem:[#allocation4 + $0x8] sm:$0xff] %vm80_vm5, %v2113_v45  ;;  %v1702_v10 = vpop.xlane.xlu0 %1701 }
 0x220   :  { %v5392_v36 = vmax.f32 %v5385_v15, %v1702_v10  ;;  %v1700_v13 = vpop.xlane.xlu1 %1699 }
 0x221   :  { %v5395_v49 = vmax.f32 %v5388_v25, %v1700_v13 }
 0x222   :  { %2035 = vst.msk [vmem:[#allocation2 + $0x18] sm:$0xff] %vm80_vm5, %v5392_v36  ;;  %1824 = vperm.xlu1 %4042, %v5392_v36  }
 0x223   :  { %2034 = vst.msk [vmem:[#allocation2 + $0x10] sm:$0xff] %vm80_vm5, %v5395_v49  ;;  %v2085_v30 = vpop.xlane.xlu0 %2084 }
 0x224   :  { %v2114_v27 = vadd.f32 %v2085_v30, %v2050_v6  ;;  %v2087_v39 = vpop.xlane.xlu1 %2086  ;;  %v2052_v6 = vld [vmem:[#allocation4 + $0x20] sm:$0xff]  ;;  %v2053_v30 = vld [vmem:[#allocation4 + $0x28] sm:$0xff] }
 0x225   :  { %v2115_v46 = vadd.f32 %v2087_v39, %v2051_v56  ;;  %v5432_v56 = vld [vmem:[#allocation2 + $0x30] sm:$0xff] }
 0x226   :  { %2130 = vst.msk [vmem:[#allocation4 + $0x10] sm:$0xff] %vm80_vm5, %v2114_v27  ;;  %1819 = vperm.xlu1 %4042, %v5395_v49  }
 0x227   :  { %2131 = vst.msk [vmem:[#allocation4 + $0x18] sm:$0xff] %vm80_vm5, %v2115_v46  ;;  %v1706_v20 = vpop.xlane.xlu0 %1705 }
 0x228   :  { %v5414_v45 = vmax.f32 %v5406_v40, %v1706_v20  ;;  %v1704_v10 = vpop.xlane.xlu1 %1703 }
 0x229   :  { %v5417_v13 = vmax.f32 %v5410_v0, %v1704_v10 }
 0x22a   :  { %2037 = vst.msk [vmem:[#allocation2 + $0x28] sm:$0xff] %vm80_vm5, %v5414_v45  ;;  %1834 = vperm.xlu1 %4042, %v5414_v45  }
 0x22b   :  { %2036 = vst.msk [vmem:[#allocation2 + $0x20] sm:$0xff] %vm80_vm5, %v5417_v13  ;;  %v2089_v39 = vpop.xlane.xlu0 %2088  ;;  %1829 = vperm.xlu0 %4041, %v5417_v13  }
 0x22c   :  { %v2116_v46 = vadd.f32 %v2089_v39, %v2052_v6  ;;  %v2091_v20 = vpop.xlane.xlu1 %2090  ;;  %v5454_v6 = vld [vmem:[#allocation2 + $0x40] sm:$0xff] }
 0x22d   :  { %v2117_v10 = vadd.f32 %v2091_v20, %v2053_v30  ;;  %v2055_v30 = vld [vmem:[#allocation4 + $0x38] sm:$0xff]  ;;  %5889 = vst [vmem:[#allocation25_spill] sm:$0xff] %v5454_v6 }
 0x22e   :  { %2132 = vst.msk [vmem:[#allocation4 + $0x20] sm:$0xff] %vm80_vm5, %v2116_v46 }
 0x22f   :  { %2133 = vst.msk [vmem:[#allocation4 + $0x28] sm:$0xff] %vm80_vm5, %v2117_v10  ;;  %v1710_v16 = vpop.xlane.xlu0 %1709  ;;  %v5451_v10 = vld [vmem:[#allocation2 + $0x48] sm:$0xff] }
 0x230   :  { %v5436_v63 = vmax.f32 %v5429_v62, %v1710_v16  ;;  %v1708_v27 = vpop.xlane.xlu1 %1707  ;;  %5888 = vst [vmem:[#allocation38_spill] sm:$0xff] %v5451_v10  ;;  %v2056_v62 = vld [vmem:[#allocation4 + $0x40] sm:$0xff] }
 0x231   :  { %v5439_v58 = vmax.f32 %v5432_v56, %v1708_v27 }
 0x232   :  { %5887 = vst [vmem:[#allocation35_spill] sm:$0xff] %v5436_v63  ;;  %2039 = vst.msk [vmem:[#allocation2 + $0x38] sm:$0xff] %vm80_vm5, %v5436_v63  ;;  %1844 = vperm.xlu1 %4042, %v5436_v63  }
 0x233   :  { %2038 = vst.msk [vmem:[#allocation2 + $0x30] sm:$0xff] %vm80_vm5, %v5439_v58  ;;  %v2093_v16 = vpop.xlane.xlu0 %2092  ;;  %1839 = vperm.xlu0 %4041, %v5439_v58  }
 0x234   :  { %v2118_v27 = vadd.f32 %v2093_v16, %v2054_v2  ;;  %v2095_v46 = vpop.xlane.xlu1 %2094  ;;  %v5476_v2 = vld [vmem:[#allocation2 + $0x50] sm:$0xff] }
 0x235   :  { %v2119_v20 = vadd.f32 %v2095_v46, %v2055_v30  ;;  %v2057_v30 = vld [vmem:[#allocation4 + $0x48] sm:$0xff] }
 0x236   :  { %2134 = vst.msk [vmem:[#allocation4 + $0x30] sm:$0xff] %vm80_vm5, %v2118_v27 }
 0x237   :  { %2135 = vst.msk [vmem:[#allocation4 + $0x38] sm:$0xff] %vm80_vm5, %v2119_v20  ;;  %v1714_v14 = vpop.xlane.xlu0 %1713  ;;  %v5473_v20 = vld [vmem:[#allocation2 + $0x58] sm:$0xff] }
 0x238   :  { %v5458_v39 = vmax.f32 %v5451_v10, %v1714_v14  ;;  %v1712_v57 = vpop.xlane.xlu1 %1711  ;;  %5892 = vst [vmem:[#allocation41_spill] sm:$0xff] %v5473_v20 }
 0x239   :  { %v5461_v63 = vmax.f32 %v5454_v6, %v1712_v57 }
 0x23a   :  { %5890 = vst [vmem:[#allocation27_spill] sm:$0xff] %v5458_v39  ;;  %2041 = vst.msk [vmem:[#allocation2 + $0x48] sm:$0xff] %vm80_vm5, %v5458_v39  ;;  %1854 = vperm.xlu1 %4042, %v5458_v39  }
 0x23b   :  { %5891 = vst [vmem:[#allocation30_spill] sm:$0xff] %v5461_v63  ;;  %2040 = vst.msk [vmem:[#allocation2 + $0x40] sm:$0xff] %vm80_vm5, %v5461_v63  ;;  %v2097_v14 = vpop.xlane.xlu0 %2096  ;;  %1849 = vperm.xlu0 %4041, %v5461_v63   ;;  %v5485_v63 = vld [vmem:[#allocation2 + $0x68] sm:$0xff] }
 0x23c   :  { %v2120_v57 = vadd.f32 %v2097_v14, %v2056_v62  ;;  %v2099_v27 = vpop.xlane.xlu1 %2098  ;;  %5894 = vst [vmem:[#allocation22_spill] sm:$0xff] %v5485_v63 }
 0x23d   :  { %v2121_v46 = vadd.f32 %v2099_v27, %v2057_v30  ;;  %v5492_v30 = vld [vmem:[#allocation2 + $0x60] sm:$0xff] }
 0x23e   :  { %2136 = vst.msk [vmem:[#allocation4 + $0x40] sm:$0xff] %vm80_vm5, %v2120_v57  ;;  %5895 = vst [vmem:[#allocation24_spill] sm:$0xff] %v5492_v30 }
 0x23f   :  { %2137 = vst.msk [vmem:[#allocation4 + $0x48] sm:$0xff] %vm80_vm5, %v2121_v46  ;;  %v1718_v39 = vpop.xlane.xlu0 %1717  ;;  %v5505_v46 = vld [vmem:[#allocation2 + $0x78] sm:$0xff] }
 0x240   :  { %v5480_v16 = vmax.f32 %v5473_v20, %v1718_v39  ;;  %v1716_v10 = vpop.xlane.xlu1 %1715  ;;  %v5512_v39 = vld [vmem:[#allocation2 + $0x70] sm:$0xff] }
 0x241   :  { %v5483_v6 = vmax.f32 %v5476_v2, %v1716_v10  ;;  %5898 = vst [vmem:[#allocation32_spill] sm:$0xff] %v5512_v39  ;;  %v2058_v20 = vld [vmem:[#allocation4 + $0x50] sm:$0xff] }
 0x242   :  { %5893 = vst [vmem:[#allocation31_spill] sm:$0xff] %v5480_v16  ;;  %2043 = vst.msk [vmem:[#allocation2 + $0x58] sm:$0xff] %vm80_vm5, %v5480_v16  ;;  %1864 = vperm.xlu1 %4042, %v5480_v16  }
 0x243   :  { %2042 = vst.msk [vmem:[#allocation2 + $0x50] sm:$0xff] %vm80_vm5, %v5483_v6  ;;  %v1722_v10 = vpop.xlane.xlu0 %1721  ;;  %1859 = vperm.xlu0 %4041, %v5483_v6  }
 0x244   :  { %v5500_v14 = vmax.f32 %v5485_v63, %v1722_v10  ;;  %v1720_v57 = vpop.xlane.xlu1 %1719 }
 0x245   :  { %v5503_v27 = vmax.f32 %v5492_v30, %v1720_v57 }
 0x246   :  { %5896 = vst [vmem:[#allocation26_spill] sm:$0xff] %v5500_v14  ;;  %2045 = vst.msk [vmem:[#allocation2 + $0x68] sm:$0xff] %vm80_vm5, %v5500_v14  ;;  %1874 = vperm.xlu1 %4042, %v5500_v14   ;;  %v5900_v14 = vmov 0.0  }
 0x247   :  { %5897 = vst [vmem:[#allocation28_spill] sm:$0xff] %v5503_v27  ;;  %2044 = vst.msk [vmem:[#allocation2 + $0x60] sm:$0xff] %vm80_vm5, %v5503_v27  ;;  %v1726_v57 = vpop.xlane.xlu0 %1725  ;;  %1869 = vperm.xlu0 %4041, %v5503_v27  }
 0x248   :  { %v5520_v16 = vmax.f32 %v5505_v46, %v1726_v57  ;;  %v1724_v62 = vpop.xlane.xlu1 %1723 }
 0x249   :  { %v5523_v63 = vmax.f32 %v5512_v39, %v1724_v62 }
 0x24a   :  { %5899 = vst [vmem:[#allocation34_spill] sm:$0xff] %v5520_v16  ;;  %2047 = vst.msk [vmem:[#allocation2 + $0x78] sm:$0xff] %vm80_vm5, %v5520_v16  ;;  %1884 = vperm.xlu1 %4042, %v5520_v16  }
 0x24b   :  { %2046 = vst.msk [vmem:[#allocation2 + $0x70] sm:$0xff] %vm80_vm5, %v5523_v63  ;;  %v2101_v10 = vpop.xlane.xlu0 %2100 }
 0x24c   :  { %v2122_v27 = vadd.f32 %v2101_v10, %v2058_v20  ;;  %v1521_v16 = vpop.permute.xlu1 %1520 }
 0x24e   :  { %2138 = vst.msk [vmem:[#allocation4 + $0x50] sm:$0xff] %vm80_vm5, %v2122_v27 }
 0x250   :  { %v1527_v9 = vpop.permute.xlu1 %1526 }
 0x251   :  { %vm1547_vm9 = vcmp.eq.s32.totalorder %v1527_v9, %v4876_v23 }
 0x253   :  { %v1515_v57 = vpop.permute.xlu0 %1514 }
 0x254   :  { %vm1543_vm3 = vcmp.eq.s32.totalorder %v1515_v57, %v4876_v23 }
 0x255   :  { %vm1658_vm4 = vmand %vm5273_vm1, %vm1543_vm3 }
 0x256   :  { %v3209_v38 = vsel %vm1658_vm4, 1.0, %v5900_v14  ;;  %vm1662_vm1 = vmand %vm5327_vm11, %vm1547_vm9 }
 0x257   :  { %v1518_v30 = vpop.permute.xlu0 %1517 }
 0x258   :  { %vm1544_vm0 = vcmp.eq.s32.totalorder %v1518_v30, %v4876_v23 }
 0x259   :  { %vm1659_vm14 = vmand %vm5307_vm7, %vm1544_vm0  ;;  %vm1545_vm7 = vcmp.eq.s32.totalorder %v1521_v16, %v4876_v23  ;;  %v5561_v16 = vsel %vm1662_vm1, 1.0, %v5900_v14 }
 0x25a   :  { %v3210_v39 = vsel %vm1659_vm14, 1.0, %v5900_v14  ;;  %vm1660_vm8 = vmand %vm5300_vm6, %vm1545_vm7 }
 0x25b   :  { %v1524_v62 = vpop.permute.xlu0 %1523  ;;  %v2076_v20 = vmul.f32 %v5205_v5, %v3210_v39  ;;  %v2075_v5 = vmul.f32 %v5177_v19, %v3209_v38  ;;  %v3211_v3 = vsel %vm1660_vm8, 1.0, %v5900_v14 }
 0x25c   :  { %vm1546_vm15 = vcmp.eq.s32.totalorder %v1524_v62, %v4876_v23  ;;  %v2079_v23 = vmul.f32 %v5222_v50, %v5561_v16 }
 0x25d   :  { %vm1661_vm2 = vmand %vm5334_vm12, %vm1546_vm15 }
 0x25e   :  { %v5543_v27 = vsel %vm1661_vm2, 1.0, %v5900_v14 }
 0x25f   :  { %v2078_v30 = vmul.f32 %v5228_v59, %v5543_v27  ;;  %v2077_v59 = vmul.f32 %v5201_v48, %v3211_v3 }
 0x266   :  { %2104 = vadd.xlane.f32.xlu0 %v2076_v20 }
 0x26a   :  { %2108 = vadd.xlane.f32.xlu0 %v2078_v30 }
 0x26e   :  { %2162 = vadd.xlane.f32.xlu0 %v5102_v18  ;;  %2102 = vadd.xlane.f32.xlu1 %v2075_v5 }
 0x272   :  { %2166 = vadd.xlane.f32.xlu0 %v5126_v37  ;;  %2106 = vadd.xlane.f32.xlu1 %v2077_v59 }
 0x276   :  { %2170 = vadd.xlane.f32.xlu0 %v5174_v41  ;;  %2110 = vadd.xlane.f32.xlu1 %v2079_v23 }
 0x27a   :  { %2174 = vadd.xlane.f32.xlu0 %v5235_v12  ;;  %2164 = vadd.xlane.f32.xlu1 %v5117_v31 }
 0x27e   :  { %2178 = vadd.xlane.f32.xlu0 %v5265_v55  ;;  %2168 = vadd.xlane.f32.xlu1 %v5181_v4 }
 0x282   :  { %2182 = vadd.xlane.f32.xlu0 %v3209_v38  ;;  %2172 = vadd.xlane.f32.xlu1 %v5226_v43 }
 0x286   :  { %2186 = vadd.xlane.f32.xlu0 %v3211_v3  ;;  %2176 = vadd.xlane.f32.xlu1 %v5258_v47 }
 0x28a   :  { %2180 = vadd.xlane.f32.xlu1 %v5353_v52 }
 0x28e   :  { %2184 = vadd.xlane.f32.xlu1 %v3210_v39 }
 0x299   :  { %v1815_v41 = vpop.permute.xlu0 %1814 }
 0x29a   :  { %v1810_v18 = vpop.permute.xlu1 %1809  ;;  %v1888_v48 = vsub.f32 %v5076_v21, %v1815_v41 }
 0x29b   :  { %v1887_v47 = vsub.f32 %v5081_v35, %v1810_v18 }
 0x29c   :  { %1879 = vperm.xlu0 %4041, %v5523_v63   ;;  %v1905_v12 = vmul.f32 1.442695, %v1888_v48 }
 0x29d   :  { %v1903_v1 = vmul.f32 1.442695, %v1887_v47 }
 0x2a1   :  { %v1825_v37 = vpop.permute.xlu1 %1824 }
 0x2a2   :  { %v1890_v53 = vsub.f32 %v5114_v28, %v1825_v37 }
 0x2a4   :  { %v1909_v21 = vmul.f32 1.442695, %v1890_v53 }
 0x2a5   :  { %v1820_v19 = vpop.permute.xlu1 %1819 }
 0x2a6   :  { %v1889_v31 = vsub.f32 %v5123_v34, %v1820_v19 }
 0x2a8   :  { %v1907_v4 = vmul.f32 1.442695, %v1889_v31 }
 0x2a9   :  { %v1835_v52 = vpop.permute.xlu1 %1834 }
 0x2aa   :  { %4045 = vpow2.f32 %v1907_v4  ;;  %v1830_v50 = vpop.permute.xlu0 %1829  ;;  %v1892_v10 = vsub.f32 %v5165_v51, %v1835_v52 }
 0x2ab   :  { %v1891_v43 = vsub.f32 %v5171_v33, %v1830_v50 }
 0x2ac   :  { %v1913_v35 = vmul.f32 1.442695, %v1892_v10 }
 0x2ad   :  { %v1911_v55 = vmul.f32 1.442695, %v1891_v43 }
 0x2af   :  { %4047 = vpow2.f32 %v1911_v55 }
 0x2b0   :  { %4049 = vpow2.f32 %v1905_v12 }
 0x2b1   :  { %4051 = vpow2.f32 %v1903_v1  ;;  %v1845_v57 = vpop.permute.xlu1 %1844 }
 0x2b2   :  { %v1840_v39 = vpop.permute.xlu0 %1839  ;;  %v1894_v62 = vsub.f32 %v5212_v11, %v1845_v57  ;;  %v2062_v57 = vld [vmem:[#allocation4 + $0x70] sm:$0xff] }
 0x2b3   :  { %v1893_v34 = vsub.f32 %v5219_v54, %v1840_v39 }
 0x2b4   :  { %v4046_v14 = vpop.eup %4045  ;;  %v1917_v38 = vmul.f32 1.442695, %v1894_v62  ;;  %v2145_v62 = vld [vmem:[#allocation5 + $0x8] sm:$0xff] }
 0x2b5   :  { %v1915_v33 = vmul.f32 1.442695, %v1893_v34  ;;  %1971 = vadd.xlane.f32.xlu1 %v4046_v14 }
 0x2b7   :  { %4053 = vpow2.f32 %v1915_v33 }
 0x2b8   :  { %4055 = vpow2.f32 %v1909_v21 }
 0x2b9   :  { %v4048_v20 = vpop.eup %4047  ;;  %v1855_v9 = vpop.permute.xlu1 %1854  ;;  %4057 = vpow2.f32 %v1913_v35 }
 0x2ba   :  { %v4050_v28 = vpop.eup %4049  ;;  %v1850_v30 = vpop.permute.xlu0 %1849  ;;  %1975 = vadd.xlane.f32.xlu1 %v4048_v20  ;;  %v1896_v51 = vsub.f32 %v5249_v42, %v1855_v9  ;;  %v2059_v20 = vld [vmem:[#allocation4 + $0x58] sm:$0xff] }
 0x2bb   :  { %v1895_v54 = vsub.f32 %v5254_v17, %v1850_v30  ;;  %1969 = vadd.xlane.f32.xlu0 %v4050_v28  ;;  %v4052_v3 = vpop.eup %4051 }
 0x2bc   :  { %v1921_v59 = vmul.f32 1.442695, %v1896_v51  ;;  %v2061_v51 = vld [vmem:[#allocation4 + $0x68] sm:$0xff] }
 0x2bd   :  { %v1919_v5 = vmul.f32 1.442695, %v1895_v54 }
 0x2bf   :  { %4059 = vpow2.f32 %v1919_v5  ;;  %1967 = vadd.xlane.f32.xlu0 %v4052_v3 }
 0x2c0   :  { %4061 = vpow2.f32 %v1917_v38  ;;  %v2147_v38 = vld [vmem:[#allocation5 + $0x18] sm:$0xff] }
 0x2c1   :  { %v4054_v23 = vpop.eup %4053  ;;  %v1865_v11 = vpop.permute.xlu1 %1864  ;;  %4063 = vpow2.f32 %v1921_v59 }
 0x2c2   :  { %v4056_v18 = vpop.eup %4055  ;;  %v1898_v37 = vsub.f32 %v5290_v60, %v1865_v11  ;;  %v1860_v41 = vpop.permute.xlu0 %1859  ;;  %1979 = vadd.xlane.f32.xlu1 %v4054_v23  ;;  %v2149_v23 = vld [vmem:[#allocation5 + $0x28] sm:$0xff]  ;;  %v2063_v11 = vld [vmem:[#allocation4 + $0x78] sm:$0xff] }
 0x2c3   :  { %v1897_v17 = vsub.f32 %v5296_v7, %v1860_v41  ;;  %1973 = vadd.xlane.f32.xlu0 %v4056_v18  ;;  %v4058_v48 = vpop.eup %4057 }
 0x2c4   :  { %v1925_v19 = vmul.f32 1.442695, %v1898_v37 }
 0x2c5   :  { %v1923_v31 = vmul.f32 1.442695, %v1897_v17  ;;  %v1875_v42 = vpop.permute.xlu1 %1874 }
 0x2c6   :  { %v1900_v4 = vsub.f32 %v5317_v8, %v1875_v42  ;;  %v1870_v50 = vpop.permute.xlu0 %1869 }
 0x2c7   :  { %4065 = vpow2.f32 %v1923_v31  ;;  %v1899_v43 = vsub.f32 %v5323_v22, %v1870_v50  ;;  %1977 = vadd.xlane.f32.xlu0 %v4058_v48  ;;  %v2146_v31 = vld [vmem:[#allocation5 + $0x10] sm:$0xff] }
 0x2c8   :  { %4067 = vpow2.f32 %v1925_v19  ;;  %v1929_v12 = vmul.f32 1.442695, %v1900_v4  ;;  %v2151_v19 = vld [vmem:[#allocation5 + $0x38] sm:$0xff] }
 0x2c9   :  { %v4060_v60 = vpop.eup %4059  ;;  %v1927_v47 = vmul.f32 1.442695, %v1899_v43  ;;  %v1885_v55 = vpop.permute.xlu1 %1884  ;;  %v2153_v43 = vld [vmem:[#allocation5 + $0x48] sm:$0xff] }
 0x2ca   :  { %v4062_v1 = vpop.eup %4061  ;;  %v1902_v7 = vsub.f32 %v5343_v29, %v1885_v55  ;;  %1983 = vadd.xlane.f32.xlu1 %v4060_v60  ;;  %v2060_v29 = vld [vmem:[#allocation4 + $0x60] sm:$0xff] }
 0x2cb   :  { %4069 = vpow2.f32 %v1927_v47  ;;  %1981 = vadd.xlane.f32.xlu0 %v4062_v1  ;;  %v4064_v52 = vpop.eup %4063 }
 0x2cc   :  { %4071 = vpow2.f32 %v1929_v12  ;;  %v1933_v53 = vmul.f32 1.442695, %v1902_v7  ;;  %v2148_v12 = vld [vmem:[#allocation5 + $0x20] sm:$0xff]  ;;  %v2155_v7 = vld [vmem:[#allocation5 + $0x58] sm:$0xff] }
 0x2ce   :  { %4073 = vpow2.f32 %v1933_v53  ;;  %v2150_v53 = vld [vmem:[#allocation5 + $0x30] sm:$0xff] }
 0x2cf   :  { %1985 = vadd.xlane.f32.xlu0 %v4064_v52 }
 0x2d1   :  { %v4066_v8 = vpop.eup %4065 }
 0x2d2   :  { %v4068_v39 = vpop.eup %4067  ;;  %1987 = vadd.xlane.f32.xlu1 %v4066_v8 }
 0x2d3   :  { %1989 = vadd.xlane.f32.xlu0 %v4068_v39 }
 0x2d5   :  { %v4070_v22 = vpop.eup %4069 }
 0x2d6   :  { %v4072_v34 = vpop.eup %4071  ;;  %1991 = vadd.xlane.f32.xlu1 %v4070_v22 }
 0x2d7   :  { %1993 = vadd.xlane.f32.xlu0 %v4072_v34  ;;  %v2157_v34 = vld [vmem:[#allocation5 + $0x68] sm:$0xff] }
 0x2d8   :  { %v4074_v14 = vpop.eup %4073 }
 0x2db   :  { %1997 = vadd.xlane.f32.xlu0 %v4074_v14  ;;  %v2152_v14 = vld [vmem:[#allocation5 + $0x40] sm:$0xff] }
 0x2df   :  { %2190 = vadd.xlane.f32.xlu0 %v5561_v16 }
 0x2f3   :  { %v2105_v21 = vpop.xlane.xlu0 %2104 }
 0x2f4   :  { %v2124_v10 = vadd.f32 %v2105_v21, %v2060_v29 }
 0x2f6   :  { %2140 = vst.msk [vmem:[#allocation4 + $0x60] sm:$0xff] %vm80_vm5, %v2124_v10 }
 0x2f7   :  { %v2109_v33 = vpop.xlane.xlu0 %2108 }
 0x2f8   :  { %v2126_v35 = vadd.f32 %v2109_v33, %v2062_v57  ;;  %v2154_v33 = vld [vmem:[#allocation5 + $0x50] sm:$0xff] }
 0x2fa   :  { %2142 = vst.msk [vmem:[#allocation4 + $0x70] sm:$0xff] %vm80_vm5, %v2126_v35 }
 0x2fb   :  { %v2163_v9 = vpop.xlane.xlu0 %2162  ;;  %v2103_v28 = vpop.xlane.xlu1 %2102 }
 0x2fc   :  { %v2193_v30 = vadd.f32 %v2163_v9, %v2145_v62  ;;  %v2123_v54 = vadd.f32 %v2103_v28, %v2059_v20  ;;  %v2156_v20 = vld [vmem:[#allocation5 + $0x60] sm:$0xff] }
 0x2fe   :  { %2209 = vst.msk [vmem:[#allocation5 + $0x8] sm:$0xff] %vm80_vm5, %v2193_v30  ;;  %2139 = vst.msk [vmem:[#allocation4 + $0x58] sm:$0xff] %vm80_vm5, %v2123_v54 }
 0x2ff   :  { %v2167_v16 = vpop.xlane.xlu0 %2166  ;;  %v2107_v5 = vpop.xlane.xlu1 %2106 }
 0x300   :  { %v2195_v3 = vadd.f32 %v2167_v16, %v2147_v38  ;;  %v2125_v59 = vadd.f32 %v2107_v5, %v2061_v51  ;;  %v5901_v16 = vsub.f32 %v5388_v25, %v5395_v49 }
 0x302   :  { %2211 = vst.msk [vmem:[#allocation5 + $0x18] sm:$0xff] %vm80_vm5, %v2195_v3  ;;  %2141 = vst.msk [vmem:[#allocation4 + $0x68] sm:$0xff] %vm80_vm5, %v2125_v59  ;;  %v1779_v5 = vmul.f32 1.442695, %v5901_v16  ;;  %v5902_v3 = vsub.f32 %v5410_v0, %v5417_v13  ;;  %v5906_v0 = vsub.f32 %v5385_v15, %v5392_v36 }
 0x303   :  { %v2171_v18 = vpop.xlane.xlu0 %2170  ;;  %v2111_v37 = vpop.xlane.xlu1 %2110 }
 0x304   :  { %v2197_v41 = vadd.f32 %v2171_v18, %v2149_v23  ;;  %v2127_v17 = vadd.f32 %v2111_v37, %v2063_v11  ;;  %v1783_v59 = vmul.f32 1.442695, %v5902_v3  ;;  %v5904_v11 = vsub.f32 %v5367_v44, %v5373_v61 }
 0x305   :  { %v1781_v13 = vmul.f32 1.442695, %v5906_v0 }
 0x306   :  { %2213 = vst.msk [vmem:[#allocation5 + $0x28] sm:$0xff] %vm80_vm5, %v2197_v41  ;;  %2143 = vst.msk [vmem:[#allocation4 + $0x78] sm:$0xff] %vm80_vm5, %v2127_v17  ;;  %v1775_v18 = vmul.f32 1.442695, %v5904_v11 }
 0x307   :  { %v2175_v42 = vpop.xlane.xlu0 %2174  ;;  %v2165_v48 = vpop.xlane.xlu1 %2164 }
 0x308   :  { %v2199_v4 = vadd.f32 %v2175_v42, %v2151_v19  ;;  %v2194_v50 = vadd.f32 %v2165_v48, %v2146_v31 }
 0x30a   :  { %2215 = vst.msk [vmem:[#allocation5 + $0x38] sm:$0xff] %vm80_vm5, %v2199_v4  ;;  %2210 = vst.msk [vmem:[#allocation5 + $0x10] sm:$0xff] %vm80_vm5, %v2194_v50 }
 0x30b   :  { %v2179_v60 = vpop.xlane.xlu0 %2178  ;;  %v2169_v47 = vpop.xlane.xlu1 %2168 }
 0x30c   :  { %v2201_v55 = vadd.f32 %v2179_v60, %v2153_v43  ;;  %v2196_v1 = vadd.f32 %v2169_v47, %v2148_v12 }
 0x30e   :  { %2217 = vst.msk [vmem:[#allocation5 + $0x48] sm:$0xff] %vm80_vm5, %v2201_v55  ;;  %2212 = vst.msk [vmem:[#allocation5 + $0x20] sm:$0xff] %vm80_vm5, %v2196_v1 }
 0x30f   :  { %v2183_v52 = vpop.xlane.xlu0 %2182  ;;  %v2173_v8 = vpop.xlane.xlu1 %2172 }
 0x310   :  { %v2203_v39 = vadd.f32 %v2183_v52, %v2155_v7  ;;  %v2198_v22 = vadd.f32 %v2173_v8, %v2150_v53 }
 0x312   :  { %2219 = vst.msk [vmem:[#allocation5 + $0x58] sm:$0xff] %vm80_vm5, %v2203_v39  ;;  %2214 = vst.msk [vmem:[#allocation5 + $0x30] sm:$0xff] %vm80_vm5, %v2198_v22 }
 0x313   :  { %v2187_v29 = vpop.xlane.xlu0 %2186  ;;  %v2177_v21 = vpop.xlane.xlu1 %2176 }
 0x314   :  { %v2205_v10 = vadd.f32 %v2187_v29, %v2157_v34  ;;  %v2200_v57 = vadd.f32 %v2177_v21, %v2152_v14 }
 0x316   :  { %2221 = vst.msk [vmem:[#allocation5 + $0x68] sm:$0xff] %vm80_vm5, %v2205_v10  ;;  %2216 = vst.msk [vmem:[#allocation5 + $0x40] sm:$0xff] %vm80_vm5, %v2200_v57 }
 0x317   :  { %v2181_v35 = vpop.xlane.xlu1 %2180 }
 0x318   :  { %v2202_v62 = vadd.f32 %v2181_v35, %v2154_v33 }
 0x31a   :  { %2218 = vst.msk [vmem:[#allocation5 + $0x50] sm:$0xff] %vm80_vm5, %v2202_v62 }
 0x31b   :  { %v1880_v9 = vpop.permute.xlu0 %1879  ;;  %v2185_v28 = vpop.xlane.xlu1 %2184 }
 0x31c   :  { %v1901_v30 = vsub.f32 %v5349_v24, %v1880_v9  ;;  %v2204_v54 = vadd.f32 %v2185_v28, %v2156_v20  ;;  %v5903_v24 = vsub.f32 %v5365_v32, %v5370_v26  ;;  %v1937_v32 = vld [vmem:[#allocation3 + $0x10] sm:$0xff] }
 0x31e   :  { %v1931_v38 = vmul.f32 1.442695, %v1901_v30  ;;  %2220 = vst.msk [vmem:[#allocation5 + $0x60] sm:$0xff] %vm80_vm5, %v2204_v54  ;;  %v1777_v23 = vmul.f32 1.442695, %v5903_v24 }
 0x320   :  { %4075 = vpow2.f32 %v1931_v38 }
 0x321   :  { %4077 = vpow2.f32 %v1779_v5 }
 0x322   :  { %4079 = vpow2.f32 %v1783_v59 }
 0x323   :  { %4081 = vpow2.f32 %v1777_v23 }
 0x324   :  { %4083 = vpow2.f32 %v1775_v18 }
 0x32a   :  { %v4076_v51 = vpop.eup %4075 }
 0x32b   :  { %1995 = vadd.xlane.f32.xlu1 %v4076_v51  ;;  %v4078_v49 = vpop.eup %4077 }
 0x32f   :  { %2188 = vadd.xlane.f32.xlu1 %v5543_v27  ;;  %v5905_v27 = vsub.f32 %v5432_v56, %v5439_v58 }
 0x331   :  { %v1787_v25 = vmul.f32 1.442695, %v5905_v27 }
 0x332   :  { %4212 = shalt.err (!%p4209_p8)
}
 0x333   :  { %s4213_s22 = scalar_lea.hbm %s5715_s5, 2048 }
 0x334   :  { %p4214_p9 = scmp.ne.s32.totalorder %s5715_s5, %s4213_s22  ;;  %p4217_p10 = scmp.lt.u32.totalorder %s4213_s22, %s5715_s5 }
 0x336   :  { %p4219_p11 = pnand %p4217_p10, %p4214_p9 }
 0x338   :  { %4222 = shalt.err (!%p4219_p11)
}
 0x339   :  { %3185 = dma.vmem_to_hbm [thread:$0]  %s3180_s17, 2048, %s5715_s5, [#allocation16], %s4257_s30, %s4257_s30, %s4258_s6   ;;  %4085 = vpow2.f32 %v1787_v25  ;;  %v1953_v44 = vmul.f32 %v4078_v49, %v1937_v32  ;;  %v5907_v26 = vsub.f32 %v5406_v40, %v5414_v45  ;;  %v4080_v36 = vpop.eup %4079  ;;  %v1939_v56 = vld [vmem:[#allocation3 + $0x20] sm:$0xff]  ;;  %v1936_v41 = vld [vmem:[#allocation3 + $0x8] sm:$0xff]  ;;  %v1941_v14 = vld [vmem:[#allocation3 + $0x30] sm:$0xff]  ;;  %v5917_v57 = vsub.f32 %v5476_v2, %v5483_v6 }
 0x33a   :  { %4087 = vpow2.f32 %v1781_v13  ;;  %v4082_v37 = vpop.eup %4081  ;;  %v5908_v17 = vld [vmem:[#allocation25_spill] sm:$0xff]  ;;  %v5909_v19 = vld [vmem:[#allocation30_spill] sm:$0xff]  ;;  %v5911_v48 = vld [vmem:[#allocation23_spill] sm:$0xff]  ;;  %v1955_v12 = vmul.f32 %v4080_v36, %v1939_v56  ;;  %s4265_s5 = smov [#allocation14]  }
 0x33b   :  { %v1785_v61 = vmul.f32 1.442695, %v5907_v26  ;;  %v5910_v31 = vsub.f32 %v5908_v17, %v5909_v19  ;;  %v5912_v4 = vld [vmem:[#allocation35_spill] sm:$0xff]  ;;  %v1952_v45 = vmul.f32 %v4082_v37, %v1936_v41  ;;  %v4084_v60 = vpop.eup %4083  ;;  %v1935_v1 = vld [vmem:[#allocation3] sm:$0xff]  ;;  %v1938_v10 = vld [vmem:[#allocation3 + $0x18] sm:$0xff]  ;;  %s3167_s29 = sshll.u32 %s4265_s5, 4  ;;  %s3168_s29 = int_to_ptr.vmem [resolvable:$true] %s3167_s29 }
 0x33c   :  { %v5913_v50 = vsub.f32 %v5911_v48, %v5912_v4  ;;  %v5914_v53 = vld [vmem:[#allocation38_spill] sm:$0xff]  ;;  %v5915_v52 = vld [vmem:[#allocation27_spill] sm:$0xff]  ;;  %v1951_v34 = vmul.f32 %v4084_v60, %v1935_v1  ;;  %v1795_v33 = vmul.f32 1.442695, %v5917_v57  ;;  %v5918_v62 = vld [vmem:[#allocation41_spill] sm:$0xff]  ;;  %s4223_s0 = scalar_lea.vmem %s3168_s29, 2048  ;;  %p4228_p13 = scmp.lt.s32.totalorder %s3168_s29, %s3168_s29 }
 0x33d   :  { %v1791_v42 = vmul.f32 1.442695, %v5910_v31  ;;  %4089 = vpow2.f32 %v1785_v61  ;;  %v5916_v8 = vsub.f32 %v5914_v53, %v5915_v52  ;;  %v5919_v20 = vld [vmem:[#allocation31_spill] sm:$0xff]  ;;  %v5921_v59 = vld [vmem:[#allocation24_spill] sm:$0xff]  ;;  %v5924_v11 = vld [vmem:[#allocation22_spill] sm:$0xff]  ;;  %p4224_p12 = scmp.ne.s32.totalorder %s3168_s29, %s4223_s0  ;;  %p4229_p0 = scmp.lt.s32.totalorder %s4223_s0, %s4223_s0 }
 0x33e   :  { %v1789_v43 = vmul.f32 1.442695, %v5913_v50  ;;  %v5920_v9 = vsub.f32 %v5918_v62, %v5919_v20  ;;  %v1940_v3 = vld [vmem:[#allocation3 + $0x28] sm:$0xff]  ;;  %v5922_v24 = vld [vmem:[#allocation28_spill] sm:$0xff]  ;;  %v1943_v13 = vld [vmem:[#allocation3 + $0x40] sm:$0xff] }
 0x33f   :  { %4091 = vpow2.f32 %v1791_v42  ;;  %v1793_v39 = vmul.f32 1.442695, %v5916_v8  ;;  %v5923_v6 = vsub.f32 %v5921_v59, %v5922_v24  ;;  %v5925_v18 = vld [vmem:[#allocation26_spill] sm:$0xff]  ;;  %v1942_v26 = vld [vmem:[#allocation3 + $0x38] sm:$0xff]  ;;  %v1945_v60 = vld [vmem:[#allocation3 + $0x50] sm:$0xff]  ;;  %p4230_p1 = por %p4229_p0, %p4228_p13 }
 0x340   :  { %4093 = vpow2.f32 %v1789_v43  ;;  %v1797_v28 = vmul.f32 1.442695, %v5920_v9  ;;  %v5926_v27 = vsub.f32 %v5924_v11, %v5925_v18  ;;  %v5929_v41 = vld [vmem:[#allocation29_spill] sm:$0xff]  ;;  %v1944_v50 = vld [vmem:[#allocation3 + $0x48] sm:$0xff] }
 0x341   :  { %4095 = vpow2.f32 %v1793_v39  ;;  %v1799_v2 = vmul.f32 1.442695, %v5923_v6  ;;  %v2935_v17 = vmax.f32 %v5929_v41, 1.0  ;;  %v1946_v1 = vld [vmem:[#allocation3 + $0x58] sm:$0xff]  ;;  %v2807_v62 = vld [vmem:[#allocation2] sm:$0xff]  ;;  %p4231_p2 = pnand %p4230_p1, %p4224_p12 }
 0x342   :  { %v1972_v15 = vpop.xlane.xlu1 %1971  ;;  %4097 = vpow2.f32 %v1795_v33  ;;  %v1801_v25 = vmul.f32 1.442695, %v5926_v27  ;;  %v2159_v18 = vld [vmem:[#allocation5 + $0x78] sm:$0xff] }
 0x343   :  { %v2001_v58 = vadd.f32 %v1972_v15, %v1953_v44  ;;  %v4086_v22 = vpop.eup %4085  ;;  %4099 = vpow2.f32 %v1797_v28  ;;  %v5927_v15 = vld [vmem:[#allocation34_spill] sm:$0xff] }
 0x344   :  { %v4088_v29 = vpop.eup %4087  ;;  %v1957_v30 = vmul.f32 %v4086_v22, %v1941_v14  ;;  %4101 = vpow2.f32 %v1799_v2  ;;  %v5928_v36 = vsub.f32 %v5505_v46, %v5927_v15  ;;  %v5930_v46 = vld [vmem:[#allocation33_spill] sm:$0xff] }
 0x345   :  { %2018 = vst.msk [vmem:[#allocation3 + $0x10] sm:$0xff] %vm80_vm5, %v2001_v58  ;;  %v1954_v38 = vmul.f32 %v4088_v29, %v1938_v10  ;;  %4103 = vpow2.f32 %v1801_v25  ;;  %v1947_v22 = vld [vmem:[#allocation3 + $0x60] sm:$0xff] }
 0x346   :  { %v1805_v58 = vmul.f32 1.442695, %v5928_v36 }
 0x347   :  { %v1976_v40 = vpop.xlane.xlu1 %1975  ;;  %v4090_v51 = vpop.eup %4089 }
 0x348   :  { %v2003_v47 = vadd.f32 %v1976_v40, %v1955_v12  ;;  %v1970_v55 = vpop.xlane.xlu0 %1969  ;;  %v1956_v0 = vmul.f32 %v4090_v51, %v1940_v3  ;;  %v2967_v40 = vmul.f32 %v5930_v46, %v2935_v17  ;;  %v1950_v51 = vld [vmem:[#allocation3 + $0x78] sm:$0xff]  ;;  %v2887_v3 = vld [vmem:[#allocation4] sm:$0xff] }
 0x349   :  { %v2000_v7 = vadd.f32 %v1970_v55, %v1952_v45  ;;  %v4092_v49 = vpop.eup %4091 }
 0x34a   :  { %2020 = vst.msk [vmem:[#allocation3 + $0x20] sm:$0xff] %vm80_vm5, %v2003_v47  ;;  %v4094_v32 = vpop.eup %4093  ;;  %v1959_v37 = vmul.f32 %v4092_v49, %v1943_v13 }
 0x34b   :  { %2017 = vst.msk [vmem:[#allocation3 + $0x8] sm:$0xff] %vm80_vm5, %v2000_v7  ;;  %v1958_v31 = vmul.f32 %v4094_v32, %v1942_v26  ;;  %v4096_v42 = vpop.eup %4095 }
 0x34c   :  { %v1968_v21 = vpop.xlane.xlu0 %1967  ;;  %v4098_v12 = vpop.eup %4097  ;;  %v1960_v45 = vmul.f32 %v4096_v42, %v1944_v50 }
 0x34d   :  { %v1999_v35 = vadd.f32 %v1968_v21, %v1951_v34  ;;  %v4100_v47 = vpop.eup %4099  ;;  %v1961_v53 = vmul.f32 %v4098_v12, %v1945_v60  ;;  %v1948_v21 = vld [vmem:[#allocation3 + $0x68] sm:$0xff] }
 0x34e   :  { %v4102_v52 = vpop.eup %4101  ;;  %v1962_v39 = vmul.f32 %v4100_v47, %v1946_v1 }
 0x34f   :  { %2016 = vst.msk [vmem:[#allocation3] sm:$0xff] %vm80_vm5, %v1999_v35  ;;  %v1980_v54 = vpop.xlane.xlu1 %1979  ;;  %v4104_v34 = vpop.eup %4103  ;;  %v1963_v35 = vmul.f32 %v4102_v52, %v1947_v22 }
 0x350   :  { %v2005_v16 = vadd.f32 %v1980_v54, %v1957_v30  ;;  %v1974_v5 = vpop.xlane.xlu0 %1973  ;;  %v1964_v9 = vmul.f32 %v4104_v34, %v1948_v21 }
 0x351   :  { %v2002_v23 = vadd.f32 %v1974_v5, %v1954_v38 }
 0x352   :  { %2022 = vst.msk [vmem:[#allocation3 + $0x30] sm:$0xff] %vm80_vm5, %v2005_v16 }
 0x353   :  { %2019 = vst.msk [vmem:[#allocation3 + $0x18] sm:$0xff] %vm80_vm5, %v2002_v23 }
 0x354   :  { %v1978_v44 = vpop.xlane.xlu0 %1977 }
 0x355   :  { %v2004_v61 = vadd.f32 %v1978_v44, %v1956_v0 }
 0x356   :  { %v2823_v56 = vld [vmem:[#allocation3] sm:$0xff] }
 0x357   :  { %4105 = vlog2.f32 %v2823_v56  ;;  %2021 = vst.msk [vmem:[#allocation3 + $0x28] sm:$0xff] %vm80_vm5, %v2004_v61  ;;  %v1984_v19 = vpop.xlane.xlu1 %1983 }
 0x358   :  { %v2007_v48 = vadd.f32 %v1984_v19, %v1959_v37  ;;  %v1982_v4 = vpop.xlane.xlu0 %1981  ;;  %4107 = vpow2.f32 %v1805_v58 }
 0x359   :  { %v2006_v43 = vadd.f32 %v1982_v4, %v1958_v31  ;;  %4109 = vrcp.f32 %v2967_v40 }
 0x35a   :  { %2024 = vst.msk [vmem:[#allocation3 + $0x40] sm:$0xff] %vm80_vm5, %v2007_v48 }
 0x35b   :  { %2023 = vst.msk [vmem:[#allocation3 + $0x38] sm:$0xff] %vm80_vm5, %v2006_v43 }
 0x35c   :  { %v1986_v55 = vpop.xlane.xlu0 %1985 }
 0x35d   :  { %v2008_v7 = vadd.f32 %v1986_v55, %v1960_v45 }
 0x35f   :  { %2025 = vst.msk [vmem:[#allocation3 + $0x48] sm:$0xff] %vm80_vm5, %v2008_v7  ;;  %v1988_v8 = vpop.xlane.xlu1 %1987 }
 0x360   :  { %v2009_v14 = vadd.f32 %v1988_v8, %v1961_v53  ;;  %v1990_v29 = vpop.xlane.xlu0 %1989 }
 0x361   :  { %v4106_v10 = vpop.eup %4105  ;;  %v2010_v57 = vadd.f32 %v1990_v29, %v1962_v39 }
 0x362   :  { %v2840_v33 = vmul.f32 0.6931472, %v4106_v10  ;;  %2026 = vst.msk [vmem:[#allocation3 + $0x50] sm:$0xff] %vm80_vm5, %v2009_v14  ;;  %v4108_v28 = vpop.eup %4107 }
 0x363   :  { %2027 = vst.msk [vmem:[#allocation3 + $0x58] sm:$0xff] %vm80_vm5, %v2010_v57  ;;  %v1992_v20 = vpop.xlane.xlu1 %1991  ;;  %v1966_v59 = vmul.f32 %v4108_v28, %v1950_v51  ;;  %v4110_v2 = vpop.eup %4109 }
 0x364   :  { %v2871_v30 = vadd.f32 %v2840_v33, %v2807_v62  ;;  %v2011_v54 = vadd.f32 %v1992_v20, %v1963_v35  ;;  %v1994_v38 = vpop.xlane.xlu0 %1993 }
 0x365   :  { %v2012_v16 = vadd.f32 %v1994_v38, %v1964_v9 }
 0x366   :  { %v2903_v5 = vmul.f32 %v2871_v30, %v5929_v41  ;;  %2028 = vst.msk [vmem:[#allocation3 + $0x60] sm:$0xff] %vm80_vm5, %v2011_v54 }
 0x367   :  { %2029 = vst.msk [vmem:[#allocation3 + $0x68] sm:$0xff] %vm80_vm5, %v2012_v16 }
 0x368   :  { %v2919_v24 = vsub.f32 %v2887_v3, %v2903_v5  ;;  %v1998_v6 = vpop.xlane.xlu0 %1997 }
 0x369   :  { %v2014_v23 = vadd.f32 %v1998_v6, %v1966_v59 }
 0x36a   :  { %v2984_v11 = vmul.f32 %v4110_v2, %v2919_v24 }
 0x36b   :  { %2031 = vst.msk [vmem:[#allocation3 + $0x78] sm:$0xff] %vm80_vm5, %v2014_v23 }
 0x36c   :  { %3130 = vst.msk [vmem:[#allocation14] sm:$0xff] %vm80_vm5, %v2984_v11  ;;  %v2191_v27 = vpop.xlane.xlu0 %2190 }
 0x36d   :  { %v2207_v25 = vadd.f32 %v2191_v27, %v2159_v18 }
 0x36e   :  { %4234 = shalt.err (!%p4231_p2)
}
 0x36f   :  { %s4235_s8 = scalar_lea.hbm %s5714_s4, 2048 }
 0x370   :  { %p4236_p3 = scmp.ne.s32.totalorder %s5714_s4, %s4235_s8  ;;  %p4239_p4 = scmp.lt.u32.totalorder %s4235_s8, %s5714_s4 }
 0x372   :  { %p4241_p5 = pnand %p4239_p4, %p4236_p3 }
 0x374   :  { %4244 = shalt.err (!%p4241_p5)
}
 0x375   :  { %3173 = dma.vmem_to_hbm [thread:$0]  %s3168_s29, 2048, %s5714_s4, [#allocation8], %s4257_s30, %s4257_s30, %s4258_s6   ;;  %2223 = vst.msk [vmem:[#allocation5 + $0x78] sm:$0xff] %vm80_vm5, %v2207_v25  ;;  %v5931_v49 = vld [vmem:[#allocation32_spill] sm:$0xff] }
 0x376   :  { %v1773_v0 = vsub.f32 %v5931_v49, %v5523_v63  ;;  %v1949_v44 = vld [vmem:[#allocation3 + $0x70] sm:$0xff] }
 0x377   :  { %v2158_v36 = vld [vmem:[#allocation5 + $0x70] sm:$0xff] }
 0x378   :  { %v1803_v13 = vmul.f32 1.442695, %v1773_v0 }
 0x37a   :  { %4111 = vpow2.f32 %v1803_v13 }
 0x384   :  { %v4112_v32 = vpop.eup %4111 }
 0x385   :  { %v1965_v26 = vmul.f32 %v4112_v32, %v1949_v44 }
 0x3b8   :  { %v1996_v61 = vpop.xlane.xlu1 %1995 }
 0x3b9   :  { %v2013_v15 = vadd.f32 %v1996_v61, %v1965_v26 }
 0x3bb   :  { %2030 = vst.msk [vmem:[#allocation3 + $0x70] sm:$0xff] %vm80_vm5, %v2013_v15 }
 0x3bc   :  { %v2189_v58 = vpop.xlane.xlu1 %2188 }
 0x3bd   :  { %v2206_v56 = vadd.f32 %v2189_v58, %v2158_v36 }
 0x3bf   :  { %2222 = vst.msk [vmem:[#allocation5 + $0x70] sm:$0xff] %vm80_vm5, %v2206_v56 }
 0x3c0   :  { %4251 = dma.done.wait [#allocation8], 2048  }
 0x3c1   :  { %4252 = vsyncadd [#allocation8], 4294965248 }
 0x3c2   :  { %4253 = dma.done.wait [#allocation16], 2048  }
 0x3c3   :  { %4254 = vsyncadd [#allocation16], 4294965248 }
 0x3c4   :  { %3192 = vsyncpa [#allocation7], 1 }
 0x3c5   :  { %3193 = vsyncpa [#allocation10], 1 }
 0x3c6   :  { %3194 = vsyncpa [#allocation13], 1 }
 0x3c7   :  { %3195 = vsyncpa [#allocation8], 1 }
 0x3c8   :  { %3196 = vsyncpa [#allocation16], 1 }

</bundles_post_ra>
